<compile_context>
chip_gen: v7x
topology: tpu7x:2x2x1
jax: 0.10.0
libtpu: 0.0.40
codegen_flags: <defaults>
</compile_context>

<pallas_src>
import functools

import jax
import jax.numpy as jnp
import numpy as np
from jax.experimental import pallas as pl
from jax.experimental.pallas import tpu as pltpu

RMAX = 80.0
RMIN = 30.0
ZMAX = 0.68
ZMIN = 0.42
NEG_SLOPE = 0.01  # torch.nn.LeakyReLU default


def _leaky(v):
    return jnp.where(v > 0, v, NEG_SLOPE * v)


def _round_up(n, m):
    return ((n + m - 1) // m) * m


def _const_block(*_, ndim):
    # grid-invariant (weight) blocks: same block every step -> never re-DMA'd.
    return (0,) * ndim


def _weight_spec(p, buffered):
    idx = functools.partial(_const_block, ndim=p.ndim)
    if buffered:
        # constant block: don't pay 2x VMEM for data that never changes
        return pl.BlockSpec(p.shape, idx, pipeline_mode=pl.Buffered(1))
    return pl.BlockSpec(p.shape, idx)


def _tpu_generation():
    try:
        kind = jax.devices()[0].device_kind.lower()
    except Exception:
        return "other"
    if "v5" in kind and ("lite" in kind or "5e" in kind):
        return "v5e"
    if "v6" in kind:
        return "v6e"
    if "v7" in kind or "7x" in kind:
        return "v7x"
    return "other"


# (edge-tile target, f32 (TB,TE,H) intermediate cap, explicit vmem limit)
_GEN_CFG = {
    "v5e":   (256, 8 << 20, 64 << 20),    # 128 MiB physical, 16 MiB default scoped
    "v6e":   (512, 16 << 20, 64 << 20),   # 128 MiB physical
    "v7x":   (256, 8 << 20, 48 << 20),    # only 64 MiB physical per TensorCore
    "other": (128, 4 << 20, None),        # conservative: default scoped VMEM
}


# ---------------------------------------------------------------------------
# stage 1: hp = mlp1(x) @ W2_0[:H] + b2_0   (edge-independent, once per row)
# ---------------------------------------------------------------------------
def mlp1_kernel(x_ref, w1_0_ref, b1_0_ref, w1_s_ref, b1_s_ref,
                w2_0h_ref, b2_0_ref, hp_ref):
    h = x_ref[...].astype(jnp.float32)
    h = _leaky(jnp.dot(h.astype(w1_0_ref.dtype), w1_0_ref[...],
                       preferred_element_type=jnp.float32) + b1_0_ref[...])
    for i in range(w1_s_ref.shape[0]):  # small static stack
        h = _leaky(jnp.dot(h.astype(w1_s_ref.dtype), w1_s_ref[i],
                           preferred_element_type=jnp.float32) + b1_s_ref[i])
    # hoisted batch-side term of mlp2 layer 0, with its bias folded in
    hp_ref[...] = jnp.dot(h.astype(w2_0h_ref.dtype), w2_0h_ref[...],
                          preferred_element_type=jnp.float32) + b2_0_ref[...]


# ---------------------------------------------------------------------------
# stage 2: mlp2 over (batch tile, edge tile) grid (edge innermost)
# ---------------------------------------------------------------------------
def mlp2_kernel(act_dtype, hp_ref, edge_ref,
                w2_0e_ref, w2_s_ref, b2_s_ref, w2_f_ref, b2_f_ref, out_ref):
    TB, H = hp_ref.shape
    TE = edge_ref.shape[0]

    hp = hp_ref[...]                                            # (TB, H) f32

    # edge normalization (python-float scalars only; no captured arrays)
    e = edge_ref[...].astype(jnp.float32)                       # (TE, 2)
    zn = (e[:, 0:1] - 0.5 * (ZMIN + ZMAX)) / (ZMAX - ZMIN)      # (TE, 1)
    rn = (e[:, 1:2] - 0.5 * (RMIN + RMAX)) / (RMAX - RMIN)      # (TE, 1)

    # mlp2 layer 0: concat([h, edge_n]) @ W0 + b0
    #   == (h @ W0[:H] + b0)  +  (z_n * W0[H] + r_n * W0[H+1])
    #        ^^^ hp (stage 1)      ^^^ ep (VPU, per edge tile)
    w_e = w2_0e_ref[...].astype(jnp.float32)                    # (2, H)
    ep = zn * w_e[0:1, :] + rn * w_e[1:2, :]                    # (TE, H)
    y = _leaky(hp[:, None, :] + ep[None, :, :])                 # (TB, TE, H)
    y = y.reshape(TB * TE, H).astype(act_dtype)

    # mlp2 middle layers (LeakyReLU); activations stay in act_dtype between
    # layers (bf16 on v6e/v7x when weights are bf16, f32 otherwise).
    # TODO(synk): for deep stacks / very large H, stream per-layer (1,H,H)
    # weight blocks with pltpu.emit_pipeline and switch to
    # lax.fori_loop(..., unroll=True) to bound vreg live ranges.
    for i in range(w2_s_ref.shape[0]):
        y = jnp.dot(y.astype(w2_s_ref.dtype), w2_s_ref[i],
                    preferred_element_type=jnp.float32) + b2_s_ref[i]
        y = _leaky(y).astype(act_dtype)

    # final H -> 1 projection as VPU mul + lane reduction: stays lane-dense and
    # lands directly in (TB, TE) layout (no 1-lane MXU matmul, no relayout).
    wf = w2_f_ref[...].astype(jnp.float32)                      # (1, H)
    y = y.astype(jnp.float32).reshape(TB, TE, H)
    out = jnp.sum(y * wf[None, :, :], axis=-1) + b2_f_ref[...]  # (TB, TE)
    out_ref[...] = jnp.maximum(out, 0.0) + 1e-8


# ---------------------------------------------------------------------------
# tile selection (generation aware)
# ---------------------------------------------------------------------------
def _select_tiles(B, Ne, H, gen):
    te_target, inter_cap, vmem_limit = _GEN_CFG.get(gen, _GEN_CFG["other"])

    TE = te_target
    while B * TE < 256 and TE < 512:          # keep >= 256 rows per mlp2 matmul
        TE *= 2
    TE = min(TE, max(128, _round_up(Ne, 128)))  # no bigger than the edge count
    TE = max(128, (TE // 128) * 128)

    max_rows = max(256, inter_cap // (4 * H))
    TB = max(1, min(B, max_rows // TE))
    if TB < B:
        TB = max(8, (TB // 8) * 8)            # tiled batch blocks must be 8-aligned
        # the 8-row minimum may overflow the intended budget for very large H:
        # shrink TE (kept a multiple of 128) until it fits again.
        while TB * TE * H * 4 > inter_cap and TE > 128:
            TE = max(128, (TE // 2) // 128 * 128)

    B_pad = _round_up(B, TB)
    Ne_pad = _round_up(Ne, TE)

    # ensure >= 2 parallel tiles exist so both v7x TensorCores get work even
    # for tiny demo-sized problems (only triggers when the grid would be 1x1).
    if B_pad // TB == 1 and Ne_pad // TE == 1 and TE >= 256 and Ne > TE // 2:
        TE //= 2
        Ne_pad = _round_up(Ne, TE)

    return TB, TE, B_pad, Ne_pad, vmem_limit


# ---------------------------------------------------------------------------
# wrapper
# ---------------------------------------------------------------------------
def cdf_forward(x, edge, params):
    """Pallas implementation of CDFModel.forward(x, edge)."""
    (w1_0, b1_0, w1_s, b1_s,
     w2_0h, w2_0e, b2_0, w2_s, b2_s, w2_f, b2_f) = params

    B, _ = x.shape
    H = w1_0.shape[1]
    ld = edge.shape[:-1]
    edge_flat = edge.reshape(-1, 2).astype(jnp.float32)
    Ne = edge_flat.shape[0]

    gen = _tpu_generation()
    TB, TE, B_pad, Ne_pad, vmem_limit = _select_tiles(B, Ne, H, gen)

    x_p = x.astype(jnp.float32)
    if B_pad != B:
        x_p = jnp.pad(x_p, ((0, B_pad - B), (0, 0)))
    e_p = edge_flat
    if Ne_pad != Ne:
        e_p = jnp.pad(e_p, ((0, Ne_pad - Ne), (0, 0)))

    # bf16 middle-layer activations only where the VPU has a native bf16 path
    act_dtype = (w2_s.dtype
                 if (w2_s.dtype == jnp.bfloat16 and gen in ("v6e", "v7x"))
                 else jnp.float32)

    def run(buffered):
        comp = dict(vmem_limit_bytes=vmem_limit) if vmem_limit else {}

        # ---- stage 1: hp = mlp1(x) @ W2_0[:H] + b2_0, gridded over batch ----
        s1_weights = [w1_0, b1_0, w1_s, b1_s, w2_0h, b2_0]
        hp = pl.pallas_call(
            mlp1_kernel,
            out_shape=jax.ShapeDtypeStruct((B_pad, H), jnp.float32),
            grid_spec=pltpu.PrefetchScalarGridSpec(
                num_scalar_prefetch=0,
                grid=(B_pad // TB,),
                in_specs=[pl.BlockSpec((TB, x_p.shape[1]), lambda bi: (bi, 0))]
                         + [_weight_spec(p, buffered) for p in s1_weights],
                out_specs=pl.BlockSpec((TB, H), lambda bi: (bi, 0)),
            ),
            compiler_params=pltpu.CompilerParams(
                dimension_semantics=("parallel",), **comp),
        )(x_p, *s1_weights)

        # ---- stage 2: mlp2 over (batch tile, edge tile) grid ----
        s2_weights = [w2_0e, w2_s, b2_s, w2_f, b2_f]
        out = pl.pallas_call(
            functools.partial(mlp2_kernel, act_dtype),
            out_shape=jax.ShapeDtypeStruct((B_pad, Ne_pad), jnp.float32),
            grid_spec=pltpu.PrefetchScalarGridSpec(
                num_scalar_prefetch=0,
                grid=(B_pad // TB, Ne_pad // TE),
                in_specs=[pl.BlockSpec((TB, H), lambda bi, ej: (bi, 0)),
                          pl.BlockSpec((TE, 2), lambda bi, ej: (ej, 0))]
                         + [_weight_spec(p, buffered) for p in s2_weights],
                out_specs=pl.BlockSpec((TB, TE), lambda bi, ej: (bi, ej)),
            ),
            compiler_params=pltpu.CompilerParams(
                dimension_semantics=("parallel", "parallel"), **comp),
        )(hp, e_p, *s2_weights)
        return out

    try:
        out = run(buffered=True)
    except Exception:
        # fallback for jax versions whose TPU lowering rejects Buffered(1)
        out = run(buffered=False)

    out = out[:B, :Ne]
    return out.reshape(B, *ld)


# ---------------------------------------------------------------------------
# parameters / reference
# ---------------------------------------------------------------------------
def make_params(key, Nin, H, Nlayers):
    """Deterministic synthetic parameters mirroring CDFModel(Nin, Nlayers, H)."""
    keys = iter(jax.random.split(key, 4 * Nlayers + 12))

    def dense(k, nin, nout):
        return jax.random.normal(k, (nin, nout), jnp.float32) / jnp.sqrt(nin)

    # mlp1: Nlayers+1 linears (Nin->H, then Nlayers of H->H), all LeakyReLU
    w1_0 = dense(next(keys), Nin, H)
    b1_0 = 0.01 * jax.random.normal(next(keys), (1, H), jnp.float32)
    w1_s = jnp.stack([dense(next(keys), H, H) for _ in range(Nlayers)])
    b1_s = 0.01 * jax.random.normal(next(keys), (Nlayers, 1, H), jnp.float32)

    # mlp2: (H+2)->H, then (Nlayers-1) of H->H (LeakyReLU), final H->1 (ReLU)
    w2_0 = dense(next(keys), H + 2, H)
    w2_0h, w2_0e = w2_0[:H], w2_0[H:]
    b2_0 = 0.01 * jax.random.normal(next(keys), (1, H), jnp.float32)
    w2_s = jnp.stack([dense(next(keys), H, H) for _ in range(Nlayers - 1)])
    b2_s = 0.01 * jax.random.normal(next(keys), (Nlayers - 1, 1, H), jnp.float32)
    w2_f = jax.random.normal(next(keys), (1, H), jnp.float32) / jnp.sqrt(H)  # row
    b2_f = 0.01 * jax.random.normal(next(keys), (1, 1), jnp.float32)

    return (w1_0, b1_0, w1_s, b1_s, w2_0h, w2_0e, b2_0, w2_s, b2_s, w2_f, b2_f)


def cast_params(params, dtype):
    """Cast matmul weights to `dtype` (e.g. bf16); keep biases f32."""
    (w1_0, b1_0, w1_s, b1_s, w2_0h, w2_0e, b2_0, w2_s, b2_s, w2_f, b2_f) = params
    c = lambda w: w.astype(dtype)
    return (c(w1_0), b1_0, c(w1_s), b1_s,
            c(w2_0h), c(w2_0e), b2_0, c(w2_s), b2_s, c(w2_f), b2_f)


def ref_forward(x, edge, params):
    """Pure-JAX reference mirroring the PyTorch forward exactly."""
    (w1_0, b1_0, w1_s, b1_s,
     w2_0h, w2_0e, b2_0, w2_s, b2_s, w2_f, b2_f) = params
    B = x.shape[0]
    ld = edge.shape[:-1]

    h = _leaky(x @ w1_0 + b1_0)
    for i in range(w1_s.shape[0]):
        h = _leaky(h @ w1_s[i] + b1_s[i])

    ef = edge.reshape(-1, 2)
    z = (ef[:, 0] - 0.5 * (ZMIN + ZMAX)) / (ZMAX - ZMIN)
    r = (ef[:, 1] - 0.5 * (RMIN + RMAX)) / (RMAX - RMIN)
    en = jnp.stack([z, r], axis=-1)
    Ne = en.shape[0]

    cat = jnp.concatenate(
        [jnp.broadcast_to(h[:, None, :], (B, Ne, h.shape[-1])),
         jnp.broadcast_to(en[None, :, :], (B, Ne, 2))], axis=-1)
    w2_0 = jnp.concatenate([w2_0h, w2_0e], axis=0)

    y = _leaky(cat @ w2_0 + b2_0)
    for i in range(w2_s.shape[0]):
        y = _leaky(y @ w2_s[i] + b2_s[i])
    y = jnp.maximum(y @ w2_f.T + b2_f, 0.0)
    return y.reshape(B, *ld) + 1e-8


if __name__ == "__main__":
    # Small but tiling-meaningful shapes: Ne = 256 edges -> the tile selector
    # yields >= 2 lane-dense edge tiles (so v7x's 2 TensorCores both get work),
    # and every mlp2 matmul has >= 256 rows.
    B, Nin, H, Nlayers = 2, 8, 128, 3
    edge_ld = (16, 16)  # Ne = 256

    key = jax.random.PRNGKey(0)
    kx, kz, kr, kp = jax.random.split(key, 4)
    x = jax.random.normal(kx, (B, Nin), jnp.float32)
    z_edges = jax.random.uniform(kz, (*edge_ld, 1), jnp.float32,
                                 minval=ZMIN, maxval=ZMAX)
    r_edges = jax.random.uniform(kr, (*edge_ld, 1), jnp.float32,
                                 minval=RMIN, maxval=RMAX)
    edge = jnp.concatenate([z_edges, r_edges], axis=-1)        # (16, 16, 2)

    params = make_params(kp, Nin, H, Nlayers)

    # f32 run: strict correctness check against the pure-JAX reference.
    out = jax.block_until_ready(cdf_forward(x, edge, params))
    ref = ref_forward(x, edge, params)
    np.testing.assert_allclose(np.asarray(out), np.asarray(ref),
                               rtol=1e-4, atol=1e-5)

    # bf16-weight run: halves weight DMA/VMEM and uses the bf16 MXU path
    # (f32 accumulation; bf16 activations between middle layers on v6e/v7x);
    # sanity-checked for shape / finiteness only.
    out_bf16 = jax.block_until_ready(
        cdf_forward(x, edge, cast_params(params, jnp.bfloat16)))
    assert out_bf16.shape == out.shape
    assert bool(jnp.all(jnp.isfinite(out_bf16)))

    print("KERNEL_OK")
</pallas_src>

<mosaic_0001>
module attributes {stable_mosaic.version = 11 : i64} {
  func.func @mlp1_kernel(%arg0: i32, %arg1: memref<2x8xf32, #tpu.memory_space<vmem>>, %arg2: memref<8x128xf32, #tpu.memory_space<vmem>>, %arg3: memref<1x128xf32, #tpu.memory_space<vmem>>, %arg4: memref<3x128x128xf32, #tpu.memory_space<vmem>>, %arg5: memref<3x1x128xf32, #tpu.memory_space<vmem>>, %arg6: memref<128x128xf32, #tpu.memory_space<vmem>>, %arg7: memref<1x128xf32, #tpu.memory_space<vmem>>, %arg8: memref<2x128xf32, #tpu.memory_space<vmem>>) attributes {dimension_semantics = [#tpu.dimension_semantics<parallel>], iteration_bounds = array<i64: 1>, scalar_prefetch = 0 : i64, scratch_operands = 0 : i64, tpu.core_type = #tpu.core_type<tc>, window_params = [{transform_indices = @transform_0, window_bounds = array<i64: 2, 8>}, {pipeline_mode = #tpu.pipeline_mode<synchronous>, transform_indices = @transform_1, window_bounds = array<i64: 8, 128>}, {pipeline_mode = #tpu.pipeline_mode<synchronous>, transform_indices = @transform_2, window_bounds = array<i64: 1, 128>}, {pipeline_mode = #tpu.pipeline_mode<synchronous>, transform_indices = @transform_3, window_bounds = array<i64: 3, 128, 128>}, {pipeline_mode = #tpu.pipeline_mode<synchronous>, transform_indices = @transform_4, window_bounds = array<i64: 3, 1, 128>}, {pipeline_mode = #tpu.pipeline_mode<synchronous>, transform_indices = @transform_5, window_bounds = array<i64: 128, 128>}, {pipeline_mode = #tpu.pipeline_mode<synchronous>, transform_indices = @transform_6, window_bounds = array<i64: 1, 128>}, {transform_indices = @transform_7, window_bounds = array<i64: 2, 128>}]} {
    %c0 = arith.constant 0 : index
    %c0_0 = arith.constant 0 : index
    %0 = vector.load %arg1[%c0, %c0_0] : memref<2x8xf32, #tpu.memory_space<vmem>>, vector<2x8xf32>
    %c0_1 = arith.constant 0 : index
    %c0_2 = arith.constant 0 : index
    %1 = vector.load %arg2[%c0_1, %c0_2] : memref<8x128xf32, #tpu.memory_space<vmem>>, vector<8x128xf32>
    %cst = arith.constant dense<0.000000e+00> : vector<2x128xf32>
    %2 = tpu.matmul %0, %1, %cst {dimension_numbers = #tpu.dot_dimension_numbers<[1], [0], [0], [1], [0, 0, 1, 1], [], []>} : vector<2x8xf32>, vector<8x128xf32>, vector<2x128xf32> -> vector<2x128xf32>
    %c0_3 = arith.constant 0 : index
    %c0_4 = arith.constant 0 : index
    %3 = vector.load %arg3[%c0_3, %c0_4] : memref<1x128xf32, #tpu.memory_space<vmem>>, vector<1x128xf32>
    %4 = vector.broadcast %3 : vector<1x128xf32> to vector<2x128xf32>
    %5 = arith.addf %2, %4 : vector<2x128xf32>
    %cst_5 = arith.constant 0.000000e+00 : f32
    %6 = vector.broadcast %cst_5 : f32 to vector<2x128xf32>
    %7 = arith.cmpf ogt, %5, %6 : vector<2x128xf32>
    %cst_6 = arith.constant 0.00999999977 : f32
    %8 = vector.broadcast %cst_6 : f32 to vector<2x128xf32>
    %9 = arith.mulf %8, %5 : vector<2x128xf32>
    %10 = arith.select %7, %5, %9 : vector<2x128xi1>, vector<2x128xf32>
    %c0_7 = arith.constant 0 : index
    %c0_8 = arith.constant 0 : index
    %c0_9 = arith.constant 0 : index
    %11 = vector.load %arg4[%c0_7, %c0_8, %c0_9] : memref<3x128x128xf32, #tpu.memory_space<vmem>>, vector<1x128x128xf32>
    %12 = vector.shape_cast %11 : vector<1x128x128xf32> to vector<128x128xf32>
    %cst_10 = arith.constant dense<0.000000e+00> : vector<2x128xf32>
    %13 = tpu.matmul %10, %12, %cst_10 {dimension_numbers = #tpu.dot_dimension_numbers<[1], [0], [0], [1], [0, 0, 1, 1], [], []>} : vector<2x128xf32>, vector<128x128xf32>, vector<2x128xf32> -> vector<2x128xf32>
    %c0_11 = arith.constant 0 : index
    %c0_12 = arith.constant 0 : index
    %c0_13 = arith.constant 0 : index
    %14 = vector.load %arg5[%c0_11, %c0_12, %c0_13] : memref<3x1x128xf32, #tpu.memory_space<vmem>>, vector<1x1x128xf32>
    %15 = vector.shape_cast %14 : vector<1x1x128xf32> to vector<1x128xf32>
    %16 = vector.broadcast %15 : vector<1x128xf32> to vector<2x128xf32>
    %17 = arith.addf %13, %16 : vector<2x128xf32>
    %cst_14 = arith.constant 0.000000e+00 : f32
    %18 = vector.broadcast %cst_14 : f32 to vector<2x128xf32>
    %19 = arith.cmpf ogt, %17, %18 : vector<2x128xf32>
    %cst_15 = arith.constant 0.00999999977 : f32
    %20 = vector.broadcast %cst_15 : f32 to vector<2x128xf32>
    %21 = arith.mulf %20, %17 : vector<2x128xf32>
    %22 = arith.select %19, %17, %21 : vector<2x128xi1>, vector<2x128xf32>
    %c1 = arith.constant 1 : index
    %c0_16 = arith.constant 0 : index
    %c0_17 = arith.constant 0 : index
    %23 = vector.load %arg4[%c1, %c0_16, %c0_17] : memref<3x128x128xf32, #tpu.memory_space<vmem>>, vector<1x128x128xf32>
    %24 = vector.shape_cast %23 : vector<1x128x128xf32> to vector<128x128xf32>
    %cst_18 = arith.constant dense<0.000000e+00> : vector<2x128xf32>
    %25 = tpu.matmul %22, %24, %cst_18 {dimension_numbers = #tpu.dot_dimension_numbers<[1], [0], [0], [1], [0, 0, 1, 1], [], []>} : vector<2x128xf32>, vector<128x128xf32>, vector<2x128xf32> -> vector<2x128xf32>
    %c1_19 = arith.constant 1 : index
    %c0_20 = arith.constant 0 : index
    %c0_21 = arith.constant 0 : index
    %26 = vector.load %arg5[%c1_19, %c0_20, %c0_21] : memref<3x1x128xf32, #tpu.memory_space<vmem>>, vector<1x1x128xf32>
    %27 = vector.shape_cast %26 : vector<1x1x128xf32> to vector<1x128xf32>
    %28 = vector.broadcast %27 : vector<1x128xf32> to vector<2x128xf32>
    %29 = arith.addf %25, %28 : vector<2x128xf32>
    %cst_22 = arith.constant 0.000000e+00 : f32
    %30 = vector.broadcast %cst_22 : f32 to vector<2x128xf32>
    %31 = arith.cmpf ogt, %29, %30 : vector<2x128xf32>
    %cst_23 = arith.constant 0.00999999977 : f32
    %32 = vector.broadcast %cst_23 : f32 to vector<2x128xf32>
    %33 = arith.mulf %32, %29 : vector<2x128xf32>
    %34 = arith.select %31, %29, %33 : vector<2x128xi1>, vector<2x128xf32>
    %c2 = arith.constant 2 : index
    %c0_24 = arith.constant 0 : index
    %c0_25 = arith.constant 0 : index
    %35 = vector.load %arg4[%c2, %c0_24, %c0_25] : memref<3x128x128xf32, #tpu.memory_space<vmem>>, vector<1x128x128xf32>
    %36 = vector.shape_cast %35 : vector<1x128x128xf32> to vector<128x128xf32>
    %cst_26 = arith.constant dense<0.000000e+00> : vector<2x128xf32>
    %37 = tpu.matmul %34, %36, %cst_26 {dimension_numbers = #tpu.dot_dimension_numbers<[1], [0], [0], [1], [0, 0, 1, 1], [], []>} : vector<2x128xf32>, vector<128x128xf32>, vector<2x128xf32> -> vector<2x128xf32>
    %c2_27 = arith.constant 2 : index
    %c0_28 = arith.constant 0 : index
    %c0_29 = arith.constant 0 : index
    %38 = vector.load %arg5[%c2_27, %c0_28, %c0_29] : memref<3x1x128xf32, #tpu.memory_space<vmem>>, vector<1x1x128xf32>
    %39 = vector.shape_cast %38 : vector<1x1x128xf32> to vector<1x128xf32>
    %40 = vector.broadcast %39 : vector<1x128xf32> to vector<2x128xf32>
    %41 = arith.addf %37, %40 : vector<2x128xf32>
    %cst_30 = arith.constant 0.000000e+00 : f32
    %42 = vector.broadcast %cst_30 : f32 to vector<2x128xf32>
    %43 = arith.cmpf ogt, %41, %42 : vector<2x128xf32>
    %cst_31 = arith.constant 0.00999999977 : f32
    %44 = vector.broadcast %cst_31 : f32 to vector<2x128xf32>
    %45 = arith.mulf %44, %41 : vector<2x128xf32>
    %46 = arith.select %43, %41, %45 : vector<2x128xi1>, vector<2x128xf32>
    %c0_32 = arith.constant 0 : index
    %c0_33 = arith.constant 0 : index
    %47 = vector.load %arg6[%c0_32, %c0_33] : memref<128x128xf32, #tpu.memory_space<vmem>>, vector<128x128xf32>
    %cst_34 = arith.constant dense<0.000000e+00> : vector<2x128xf32>
    %48 = tpu.matmul %46, %47, %cst_34 {dimension_numbers = #tpu.dot_dimension_numbers<[1], [0], [0], [1], [0, 0, 1, 1], [], []>} : vector<2x128xf32>, vector<128x128xf32>, vector<2x128xf32> -> vector<2x128xf32>
    %c0_35 = arith.constant 0 : index
    %c0_36 = arith.constant 0 : index
    %49 = vector.load %arg7[%c0_35, %c0_36] : memref<1x128xf32, #tpu.memory_space<vmem>>, vector<1x128xf32>
    %50 = vector.broadcast %49 : vector<1x128xf32> to vector<2x128xf32>
    %51 = arith.addf %48, %50 : vector<2x128xf32>
    %c0_37 = arith.constant 0 : index
    %c0_38 = arith.constant 0 : index
    %52 = vector.load %arg8[%c0_37, %c0_38] : memref<2x128xf32, #tpu.memory_space<vmem>>, vector<2x128xf32>
    tpu.vector_store %arg8[%c0_37, %c0_38], %51 {strides = array<i32>} : memref<2x128xf32, #tpu.memory_space<vmem>>, vector<2x128xf32>,
    return
  }
  func.func @transform_0(%arg0: i32) -> (i32, i32) {
    %c0_i32 = arith.constant 0 : i32
    %c0_i32_0 = arith.constant 0 : i32
    return %arg0, %c0_i32 : i32, i32
  }
  func.func @transform_1(%arg0: i32) -> (i32, i32) {
    %c0_i32 = arith.constant 0 : i32
    %c0_i32_0 = arith.constant 0 : i32
    %c0_i32_1 = arith.constant 0 : i32
    return %c0_i32, %c0_i32_0 : i32, i32
  }
  func.func @transform_2(%arg0: i32) -> (i32, i32) {
    %c0_i32 = arith.constant 0 : i32
    %c0_i32_0 = arith.constant 0 : i32
    %c0_i32_1 = arith.constant 0 : i32
    return %c0_i32, %c0_i32_0 : i32, i32
  }
  func.func @transform_3(%arg0: i32) -> (i32, i32, i32) {
    %c0_i32 = arith.constant 0 : i32
    %c0_i32_0 = arith.constant 0 : i32
    %c0_i32_1 = arith.constant 0 : i32
    %c0_i32_2 = arith.constant 0 : i32
    return %c0_i32, %c0_i32_0, %c0_i32_1 : i32, i32, i32
  }
  func.func @transform_4(%arg0: i32) -> (i32, i32, i32) {
    %c0_i32 = arith.constant 0 : i32
    %c0_i32_0 = arith.constant 0 : i32
    %c0_i32_1 = arith.constant 0 : i32
    %c0_i32_2 = arith.constant 0 : i32
    return %c0_i32, %c0_i32_0, %c0_i32_1 : i32, i32, i32
  }
  func.func @transform_5(%arg0: i32) -> (i32, i32) {
    %c0_i32 = arith.constant 0 : i32
    %c0_i32_0 = arith.constant 0 : i32
    %c0_i32_1 = arith.constant 0 : i32
    return %c0_i32, %c0_i32_0 : i32, i32
  }
  func.func @transform_6(%arg0: i32) -> (i32, i32) {
    %c0_i32 = arith.constant 0 : i32
    %c0_i32_0 = arith.constant 0 : i32
    %c0_i32_1 = arith.constant 0 : i32
    return %c0_i32, %c0_i32_0 : i32, i32
  }
  func.func @transform_7(%arg0: i32) -> (i32, i32) {
    %c0_i32 = arith.constant 0 : i32
    %c0_i32_0 = arith.constant 0 : i32
    return %arg0, %c0_i32 : i32, i32
  }
}

module attributes {stable_mosaic.version = 11 : i64} {
  func.func @mlp1_kernel(%arg0: i32, %arg1: memref<2x8xf32, #tpu.memory_space<vmem>>, %arg2: memref<8x128xf32, #tpu.memory_space<vmem>>, %arg3: memref<1x128xf32, #tpu.memory_space<vmem>>, %arg4: memref<3x128x128xf32, #tpu.memory_space<vmem>>, %arg5: memref<3x1x128xf32, #tpu.memory_space<vmem>>, %arg6: memref<128x128xf32, #tpu.memory_space<vmem>>, %arg7: memref<1x128xf32, #tpu.memory_space<vmem>>, %arg8: memref<2x128xf32, #tpu.memory_space<vmem>>) attributes {dimension_semantics = [#tpu.dimension_semantics<parallel>], iteration_bounds = array<i64: 1>, scalar_prefetch = 0 : i64, scratch_operands = 0 : i64, tpu.core_type = #tpu.core_type<tc>, window_params = [{transform_indices = @transform_0, window_bounds = array<i64: 2, 8>}, {pipeline_mode = #tpu.pipeline_mode<synchronous>, transform_indices = @transform_1, window_bounds = array<i64: 8, 128>}, {pipeline_mode = #tpu.pipeline_mode<synchronous>, transform_indices = @transform_2, window_bounds = array<i64: 1, 128>}, {pipeline_mode = #tpu.pipeline_mode<synchronous>, transform_indices = @transform_3, window_bounds = array<i64: 3, 128, 128>}, {pipeline_mode = #tpu.pipeline_mode<synchronous>, transform_indices = @transform_4, window_bounds = array<i64: 3, 1, 128>}, {pipeline_mode = #tpu.pipeline_mode<synchronous>, transform_indices = @transform_5, window_bounds = array<i64: 128, 128>}, {pipeline_mode = #tpu.pipeline_mode<synchronous>, transform_indices = @transform_6, window_bounds = array<i64: 1, 128>}, {transform_indices = @transform_7, window_bounds = array<i64: 2, 128>}]} {
    %c0 = arith.constant 0 : index
    %c0_0 = arith.constant 0 : index
    %0 = vector.load %arg1[%c0, %c0_0] : memref<2x8xf32, #tpu.memory_space<vmem>>, vector<2x8xf32>
    %c0_1 = arith.constant 0 : index
    %c0_2 = arith.constant 0 : index
    %1 = vector.load %arg2[%c0_1, %c0_2] : memref<8x128xf32, #tpu.memory_space<vmem>>, vector<8x128xf32>
    %cst = arith.constant dense<0.000000e+00> : vector<2x128xf32>
    %2 = tpu.matmul %0, %1, %cst {dimension_numbers = #tpu.dot_dimension_numbers<[1], [0], [0], [1], [0, 0, 1, 1], [], []>} : vector<2x8xf32>, vector<8x128xf32>, vector<2x128xf32> -> vector<2x128xf32>
    %c0_3 = arith.constant 0 : index
    %c0_4 = arith.constant 0 : index
    %3 = vector.load %arg3[%c0_3, %c0_4] : memref<1x128xf32, #tpu.memory_space<vmem>>, vector<1x128xf32>
    %4 = vector.broadcast %3 : vector<1x128xf32> to vector<2x128xf32>
    %5 = arith.addf %2, %4 : vector<2x128xf32>
    %cst_5 = arith.constant 0.000000e+00 : f32
    %6 = vector.broadcast %cst_5 : f32 to vector<2x128xf32>
    %7 = arith.cmpf ogt, %5, %6 : vector<2x128xf32>
    %cst_6 = arith.constant 0.00999999977 : f32
    %8 = vector.broadcast %cst_6 : f32 to vector<2x128xf32>
    %9 = arith.mulf %8, %5 : vector<2x128xf32>
    %10 = arith.select %7, %5, %9 : vector<2x128xi1>, vector<2x128xf32>
    %c0_7 = arith.constant 0 : index
    %c0_8 = arith.constant 0 : index
    %c0_9 = arith.constant 0 : index
    %11 = vector.load %arg4[%c0_7, %c0_8, %c0_9] : memref<3x128x128xf32, #tpu.memory_space<vmem>>, vector<1x128x128xf32>
    %12 = vector.shape_cast %11 : vector<1x128x128xf32> to vector<128x128xf32>
    %cst_10 = arith.constant dense<0.000000e+00> : vector<2x128xf32>
    %13 = tpu.matmul %10, %12, %cst_10 {dimension_numbers = #tpu.dot_dimension_numbers<[1], [0], [0], [1], [0, 0, 1, 1], [], []>} : vector<2x128xf32>, vector<128x128xf32>, vector<2x128xf32> -> vector<2x128xf32>
    %c0_11 = arith.constant 0 : index
    %c0_12 = arith.constant 0 : index
    %c0_13 = arith.constant 0 : index
    %14 = vector.load %arg5[%c0_11, %c0_12, %c0_13] : memref<3x1x128xf32, #tpu.memory_space<vmem>>, vector<1x1x128xf32>
    %15 = vector.shape_cast %14 : vector<1x1x128xf32> to vector<1x128xf32>
    %16 = vector.broadcast %15 : vector<1x128xf32> to vector<2x128xf32>
    %17 = arith.addf %13, %16 : vector<2x128xf32>
    %cst_14 = arith.constant 0.000000e+00 : f32
    %18 = vector.broadcast %cst_14 : f32 to vector<2x128xf32>
    %19 = arith.cmpf ogt, %17, %18 : vector<2x128xf32>
    %cst_15 = arith.constant 0.00999999977 : f32
    %20 = vector.broadcast %cst_15 : f32 to vector<2x128xf32>
    %21 = arith.mulf %20, %17 : vector<2x128xf32>
    %22 = arith.select %19, %17, %21 : vector<2x128xi1>, vector<2x128xf32>
    %c1 = arith.constant 1 : index
    %c0_16 = arith.constant 0 : index
    %c0_17 = arith.constant 0 : index
    %23 = vector.load %arg4[%c1, %c0_16, %c0_17] : memref<3x128x128xf32, #tpu.memory_space<vmem>>, vector<1x128x128xf32>
    %24 = vector.shape_cast %23 : vector<1x128x128xf32> to vector<128x128xf32>
    %cst_18 = arith.constant dense<0.000000e+00> : vector<2x128xf32>
    %25 = tpu.matmul %22, %24, %cst_18 {dimension_numbers = #tpu.dot_dimension_numbers<[1], [0], [0], [1], [0, 0, 1, 1], [], []>} : vector<2x128xf32>, vector<128x128xf32>, vector<2x128xf32> -> vector<2x128xf32>
    %c1_19 = arith.constant 1 : index
    %c0_20 = arith.constant 0 : index
    %c0_21 = arith.constant 0 : index
    %26 = vector.load %arg5[%c1_19, %c0_20, %c0_21] : memref<3x1x128xf32, #tpu.memory_space<vmem>>, vector<1x1x128xf32>
    %27 = vector.shape_cast %26 : vector<1x1x128xf32> to vector<1x128xf32>
    %28 = vector.broadcast %27 : vector<1x128xf32> to vector<2x128xf32>
    %29 = arith.addf %25, %28 : vector<2x128xf32>
    %cst_22 = arith.constant 0.000000e+00 : f32
    %30 = vector.broadcast %cst_22 : f32 to vector<2x128xf32>
    %31 = arith.cmpf ogt, %29, %30 : vector<2x128xf32>
    %cst_23 = arith.constant 0.00999999977 : f32
    %32 = vector.broadcast %cst_23 : f32 to vector<2x128xf32>
    %33 = arith.mulf %32, %29 : vector<2x128xf32>
    %34 = arith.select %31, %29, %33 : vector<2x128xi1>, vector<2x128xf32>
    %c2 = arith.constant 2 : index
    %c0_24 = arith.constant 0 : index
    %c0_25 = arith.constant 0 : index
    %35 = vector.load %arg4[%c2, %c0_24, %c0_25] : memref<3x128x128xf32, #tpu.memory_space<vmem>>, vector<1x128x128xf32>
    %36 = vector.shape_cast %35 : vector<1x128x128xf32> to vector<128x128xf32>
    %cst_26 = arith.constant dense<0.000000e+00> : vector<2x128xf32>
    %37 = tpu.matmul %34, %36, %cst_26 {dimension_numbers = #tpu.dot_dimension_numbers<[1], [0], [0], [1], [0, 0, 1, 1], [], []>} : vector<2x128xf32>, vector<128x128xf32>, vector<2x128xf32> -> vector<2x128xf32>
    %c2_27 = arith.constant 2 : index
    %c0_28 = arith.constant 0 : index
    %c0_29 = arith.constant 0 : index
    %38 = vector.load %arg5[%c2_27, %c0_28, %c0_29] : memref<3x1x128xf32, #tpu.memory_space<vmem>>, vector<1x1x128xf32>
    %39 = vector.shape_cast %38 : vector<1x1x128xf32> to vector<1x128xf32>
    %40 = vector.broadcast %39 : vector<1x128xf32> to vector<2x128xf32>
    %41 = arith.addf %37, %40 : vector<2x128xf32>
    %cst_30 = arith.constant 0.000000e+00 : f32
    %42 = vector.broadcast %cst_30 : f32 to vector<2x128xf32>
    %43 = arith.cmpf ogt, %41, %42 : vector<2x128xf32>
    %cst_31 = arith.constant 0.00999999977 : f32
    %44 = vector.broadcast %cst_31 : f32 to vector<2x128xf32>
    %45 = arith.mulf %44, %41 : vector<2x128xf32>
    %46 = arith.select %43, %41, %45 : vector<2x128xi1>, vector<2x128xf32>
    %c0_32 = arith.constant 0 : index
    %c0_33 = arith.constant 0 : index
    %47 = vector.load %arg6[%c0_32, %c0_33] : memref<128x128xf32, #tpu.memory_space<vmem>>, vector<128x128xf32>
    %cst_34 = arith.constant dense<0.000000e+00> : vector<2x128xf32>
    %48 = tpu.matmul %46, %47, %cst_34 {dimension_numbers = #tpu.dot_dimension_numbers<[1], [0], [0], [1], [0, 0, 1, 1], [], []>} : vector<2x128xf32>, vector<128x128xf32>, vector<2x128xf32> -> vector<2x128xf32>
    %c0_35 = arith.constant 0 : index
    %c0_36 = arith.constant 0 : index
    %49 = vector.load %arg7[%c0_35, %c0_36] : memref<1x128xf32, #tpu.memory_space<vmem>>, vector<1x128xf32>
    %50 = vector.broadcast %49 : vector<1x128xf32> to vector<2x128xf32>
    %51 = arith.addf %48, %50 : vector<2x128xf32>
    %c0_37 = arith.constant 0 : index
    %c0_38 = arith.constant 0 : index
    %52 = vector.load %arg8[%c0_37, %c0_38] : memref<2x128xf32, #tpu.memory_space<vmem>>, vector<2x128xf32>
    tpu.vector_store %arg8[%c0_37, %c0_38], %51 {strides = array<i32>} : memref<2x128xf32, #tpu.memory_space<vmem>>, vector<2x128xf32>,
    return
  }
  func.func @transform_0(%arg0: i32) -> (i32, i32) {
    %c0_i32 = arith.constant 0 : i32
    %c0_i32_0 = arith.constant 0 : i32
    return %arg0, %c0_i32 : i32, i32
  }
  func.func @transform_1(%arg0: i32) -> (i32, i32) {
    %c0_i32 = arith.constant 0 : i32
    %c0_i32_0 = arith.constant 0 : i32
    %c0_i32_1 = arith.constant 0 : i32
    return %c0_i32, %c0_i32_0 : i32, i32
  }
  func.func @transform_2(%arg0: i32) -> (i32, i32) {
    %c0_i32 = arith.constant 0 : i32
    %c0_i32_0 = arith.constant 0 : i32
    %c0_i32_1 = arith.constant 0 : i32
    return %c0_i32, %c0_i32_0 : i32, i32
  }
  func.func @transform_3(%arg0: i32) -> (i32, i32, i32) {
    %c0_i32 = arith.constant 0 : i32
    %c0_i32_0 = arith.constant 0 : i32
    %c0_i32_1 = arith.constant 0 : i32
    %c0_i32_2 = arith.constant 0 : i32
    return %c0_i32, %c0_i32_0, %c0_i32_1 : i32, i32, i32
  }
  func.func @transform_4(%arg0: i32) -> (i32, i32, i32) {
    %c0_i32 = arith.constant 0 : i32
    %c0_i32_0 = arith.constant 0 : i32
    %c0_i32_1 = arith.constant 0 : i32
    %c0_i32_2 = arith.constant 0 : i32
    return %c0_i32, %c0_i32_0, %c0_i32_1 : i32, i32, i32
  }
  func.func @transform_5(%arg0: i32) -> (i32, i32) {
    %c0_i32 = arith.constant 0 : i32
    %c0_i32_0 = arith.constant 0 : i32
    %c0_i32_1 = arith.constant 0 : i32
    return %c0_i32, %c0_i32_0 : i32, i32
  }
  func.func @transform_6(%arg0: i32) -> (i32, i32) {
    %c0_i32 = arith.constant 0 : i32
    %c0_i32_0 = arith.constant 0 : i32
    %c0_i32_1 = arith.constant 0 : i32
    return %c0_i32, %c0_i32_0 : i32, i32
  }
  func.func @transform_7(%arg0: i32) -> (i32, i32) {
    %c0_i32 = arith.constant 0 : i32
    %c0_i32_0 = arith.constant 0 : i32
    return %arg0, %c0_i32 : i32, i32
  }
}

</mosaic_0001>

<bundles_post_ra>
// kernel: tpu_custom_call.1
= control target key start
LH: loop header
LB: loop body
LE: loop exit
PB: predicated region body
PF: predicated region fallthrough
CT: control target
= control target key end

     0   :  { %12 = vsyncpa [#allocation3], 0  ;;  %s1182_s0 = inlined_call_operand.hbm [shape: f32[2,8], index: 0, kind: input, shape index: {}]   ;;  %s1183_s1 = inlined_call_operand.hbm [shape: f32[8,128], index: 1, kind: input, shape index: {}]   ;;  %s1184_s2 = inlined_call_operand.vmem [shape: f32[1,128], index: 2, kind: input, shape index: {}]   ;;  %s1185_s3 = inlined_call_operand.hbm [shape: f32[3,128,128], index: 3, kind: input, shape index: {}]   ;;  %s1186_s4 = inlined_call_operand.vmem [shape: f32[3,1,128], index: 4, kind: input, shape index: {}]   ;;  %s1187_s5 = inlined_call_operand.hbm [shape: f32[128,128], index: 5, kind: input, shape index: {}]   ;;  %s1188_s6 = inlined_call_operand.vmem [shape: f32[1,128], index: 6, kind: input, shape index: {}]   ;;  %s1189_s7 = inlined_call_operand.hbm [shape: f32[2,128], index: 7, kind: output, shape index: {}]  }
   0x1   :  { %13 = vsyncpa [#allocation6], 0 }
   0x2   :  { %14 = vsyncpa [#allocation9], 0 }
   0x3   :  { %15 = vsyncpa [#allocation4], 0  ;;  %s1014_s24 = smov [#allocation5]   ;;  %s1015_s26 = smov [#allocation2]  }
   0x4   :  { %s32_s25 = sshll.u32 %s1014_s24, 4  ;;  %s22_s27 = sshll.u32 %s1015_s26, 4  ;;  %s33_s25 = int_to_ptr.vmem [resolvable:$true] %s32_s25  ;;  %s23_s27 = int_to_ptr.vmem [resolvable:$true] %s22_s27 }
   0x5   :  { %s896_s30 = scalar_lea.hbm %s1183_s1, 128 }
   0x6   :  { %p897_p0 = scmp.ne.s32.totalorder %s1183_s1, %s896_s30  ;;  %p900_p1 = scmp.lt.u32.totalorder %s896_s30, %s1183_s1 }
   0x8   :  { %p902_p2 = pnand %p900_p1, %p897_p0 }
   0xa   :  { %905 = shalt.err (!%p902_p2)
}
   0xb   :  { %s906_s12 = scalar_lea.vmem %s33_s25, 128  ;;  %p911_p4 = scmp.lt.s32.totalorder %s33_s25, %s33_s25 }
   0xc   :  { %p907_p3 = scmp.ne.s32.totalorder %s33_s25, %s906_s12  ;;  %p912_p5 = scmp.lt.s32.totalorder %s906_s12, %s906_s12 }
   0xe   :  { %p913_p6 = por %p912_p5, %p911_p4 }
  0x10   :  { %p914_p7 = pnand %p913_p6, %p907_p3 }
  0x12   :  { %917 = shalt.err (!%p914_p7)
}
  0x13   :  { %35 = dma.hbm_to_vmem [thread:$0]  %s1183_s1, 128, %s33_s25, [#allocation6]  }
  0x14   :  { %s918_s17 = scalar_lea.hbm %s1182_s0, 32 }
  0x15   :  { %p919_p8 = scmp.ne.s32.totalorder %s1182_s0, %s918_s17  ;;  %p922_p9 = scmp.lt.u32.totalorder %s918_s17, %s1182_s0 }
  0x17   :  { %p924_p10 = pnand %p922_p9, %p919_p8 }
  0x19   :  { %927 = shalt.err (!%p924_p10)
}
  0x1a   :  { %s928_s22 = scalar_lea.vmem %s23_s27, 32  ;;  %p933_p12 = scmp.lt.s32.totalorder %s23_s27, %s23_s27 }
  0x1b   :  { %p929_p11 = scmp.ne.s32.totalorder %s23_s27, %s928_s22  ;;  %p934_p13 = scmp.lt.s32.totalorder %s928_s22, %s928_s22 }
  0x1d   :  { %p935_p0 = por %p934_p13, %p933_p12 }
  0x1f   :  { %p936_p1 = pnand %p935_p0, %p929_p11 }
  0x21   :  { %939 = shalt.err (!%p936_p1)
}
  0x22   :  { %25 = dma.hbm_to_vmem [thread:$0]  %s1182_s0, 32, %s23_s27, [#allocation3]  }
  0x23   :  { %s1016_s24 = smov [#allocation7]   ;;  %s940_s29 = scalar_lea.hbm %s1185_s3, 6144 }
  0x24   :  { %s43_s25 = sshll.u32 %s1016_s24, 4  ;;  %p941_p2 = scmp.ne.s32.totalorder %s1185_s3, %s940_s29  ;;  %s44_s25 = int_to_ptr.vmem [resolvable:$true] %s43_s25 }
  0x25   :  { %p944_p3 = scmp.lt.u32.totalorder %s940_s29, %s1185_s3 }
  0x27   :  { %p946_p4 = pnand %p944_p3, %p941_p2 }
  0x29   :  { %949 = shalt.err (!%p946_p4)
}
  0x2a   :  { %s950_s11 = scalar_lea.vmem %s44_s25, 6144  ;;  %p955_p6 = scmp.lt.s32.totalorder %s44_s25, %s44_s25 }
  0x2b   :  { %p951_p5 = scmp.ne.s32.totalorder %s44_s25, %s950_s11  ;;  %p956_p7 = scmp.lt.s32.totalorder %s950_s11, %s950_s11 }
  0x2d   :  { %p957_p8 = por %p956_p7, %p955_p6 }
  0x2f   :  { %p958_p9 = pnand %p957_p8, %p951_p5 }
  0x31   :  { %961 = shalt.err (!%p958_p9)
}
  0x32   :  { %s1017_s0 = smov 128   ;;  %s1018_s27 = smov 8  }
  0x33   :  { %49 = dma.hbm_to_vmem [thread:$0]  %s1185_s3, 6144, %s44_s25, [#allocation6], %s1017_s0, %s1017_s0, %s1018_s27  }
  0x34   :  { %s1019_s14 = smov [#allocation8]   ;;  %s962_s18 = scalar_lea.hbm %s1187_s5, 2048 }
  0x35   :  { %s57_s15 = sshll.u32 %s1019_s14, 4  ;;  %p963_p10 = scmp.ne.s32.totalorder %s1187_s5, %s962_s18  ;;  %s58_s15 = int_to_ptr.vmem [resolvable:$true] %s57_s15 }
  0x36   :  { %p966_p11 = scmp.lt.u32.totalorder %s962_s18, %s1187_s5 }
  0x38   :  { %p968_p12 = pnand %p966_p11, %p963_p10 }
  0x3a   :  { %971 = shalt.err (!%p968_p12)
}
  0x3b   :  { %s972_s1 = scalar_lea.vmem %s58_s15, 2048  ;;  %p977_p0 = scmp.lt.s32.totalorder %s58_s15, %s58_s15 }
  0x3c   :  { %p973_p13 = scmp.ne.s32.totalorder %s58_s15, %s972_s1  ;;  %p978_p1 = scmp.lt.s32.totalorder %s972_s1, %s972_s1 }
  0x3e   :  { %p979_p2 = por %p978_p1, %p977_p0 }
  0x40   :  { %p980_p3 = pnand %p979_p2, %p973_p13 }
  0x42   :  { %983 = shalt.err (!%p980_p3)
}
  0x43   :  { %63 = dma.hbm_to_vmem [thread:$0]  %s1187_s5, 2048, %s58_s15, [#allocation9], %s1017_s0, %s1017_s0, %s1018_s27  }
  0x44   :  { %1006 = dma.done.wait [#allocation3], 32  }
  0x45   :  { %1007 = vsyncadd [#allocation3], 4294967264 }
  0x46   :  { %1008 = dma.done.wait [#allocation6], 6272  }
  0x47   :  { %1009 = vsyncadd [#allocation6], 4294961024 }
  0x48   :  { %1010 = dma.done.wait [#allocation9], 2048  }
  0x49   :  { %1011 = vsyncadd [#allocation9], 4294965248  ;;  %v1020_v0 = vmov 0.0   ;;  %vm1021_vm0 = vmmov 0   ;;  %v1022_v1 = vmov 0.0|0.0   ;;  %vm87_vm1 = vcmask 64512  }
  0x4a   :  { %645 = vmatprep.subr.mxu0 %v1020_v0  ;;  %647 = vmatprep.mubr.msk.f32.mxu0 %vm1021_vm0, %v1020_v0  ;;  %v79_v2 = vld [vmem:[#allocation5] sm:$0xff]  ;;  %v78_v3 = vld [vmem:[#allocation2] sm:$0x3]  ;;  %v164_v4 = vld [vmem:[#allocation7] sm:$0xff]  ;;  %s1023_s10 = smov [#allocation10]  }
  0x4b   :  { %790 = vmatprep.subr.bf16.mxu1 %v1022_v1  ;;  %682 = vmatprep.mubr.msk.f32.mxu1 %vm1021_vm0, %v1020_v0  ;;  %v165_v5 = vld [vmem:[#allocation7 + $0x8] sm:$0xff]  ;;  %v166_v6 = vld [vmem:[#allocation7 + $0x10] sm:$0xff]  ;;  %v167_v7 = vld [vmem:[#allocation7 + $0x18] sm:$0xff]  ;;  %s556_s11 = sshll.u32 %s1023_s10, 4  ;;  %s557_s11 = int_to_ptr.vmem [resolvable:$true] %s556_s11 }
  0x4c   :  { %646 = vmatpush3.msra.mxu0 %v79_v2  ;;  %v791_v8 = vpack.c.bf16 %v165_v5, %v164_v4  ;;  %v794_v9 = vpack.c.bf16 %v167_v7, %v166_v6  ;;  %v168_v10 = vld [vmem:[#allocation7 + $0x20] sm:$0xff]  ;;  %v169_v11 = vld [vmem:[#allocation7 + $0x28] sm:$0xff]  ;;  %v170_v13 = vld [vmem:[#allocation7 + $0x30] sm:$0xff]  ;;  %s984_s0 = scalar_lea.vmem %s557_s11, 32  ;;  %p989_p5 = scmp.lt.s32.totalorder %s557_s11, %s557_s11 }
  0x4d   :  { %648 = vmatmul.mubr.msk.f32.vlgmr.msra.gmra.mrb[0].mxu0 %vm87_vm1, %v78_v3  ;;  %814 = vmatprep.subr.bf16.mxu0 %v1022_v1  ;;  %v797_v12 = vpack.c.bf16 %v169_v11, %v168_v10  ;;  %v171_v14 = vld [vmem:[#allocation7 + $0x38] sm:$0xff]  ;;  %v172_v16 = vld [vmem:[#allocation7 + $0x40] sm:$0xff]  ;;  %v173_v17 = vld [vmem:[#allocation7 + $0x48] sm:$0xff]  ;;  %p985_p4 = scmp.ne.s32.totalorder %s557_s11, %s984_s0  ;;  %p990_p6 = scmp.lt.s32.totalorder %s984_s0, %s984_s0 }
  0x4e   :  { %717 = vmatprep.mubr.msk.f32.mxu0 %vm1021_vm0, %v1020_v0  ;;  %792 = vmatpush3.bf16.msra.mxu1 %v791_v8  ;;  %v800_v15 = vpack.c.bf16 %v171_v14, %v170_v13  ;;  %v803_v18 = vpack.c.bf16 %v173_v17, %v172_v16  ;;  %v174_v19 = vld [vmem:[#allocation7 + $0x50] sm:$0xff]  ;;  %v175_v20 = vld [vmem:[#allocation7 + $0x58] sm:$0xff]  ;;  %v176_v22 = vld [vmem:[#allocation7 + $0x60] sm:$0xff] }
  0x4f   :  { %793 = vmatprep.subr.bf16.mxu1 %v1022_v1  ;;  %v806_v21 = vpack.c.bf16 %v175_v20, %v174_v19  ;;  %v177_v23 = vld [vmem:[#allocation7 + $0x68] sm:$0xff]  ;;  %v178_v25 = vld [vmem:[#allocation7 + $0x70] sm:$0xff]  ;;  %v179_v26 = vld [vmem:[#allocation7 + $0x78] sm:$0xff]  ;;  %p991_p7 = por %p990_p6, %p989_p5 }
  0x50   :  { %v809_v24 = vpack.c.bf16 %v177_v23, %v176_v22  ;;  %v812_v27 = vpack.c.bf16 %v179_v26, %v178_v25  ;;  %v261_v28 = vld [vmem:[#allocation7 + $0x80] sm:$0xff]  ;;  %v262_v29 = vld [vmem:[#allocation7 + $0x88] sm:$0xff]  ;;  %v263_v30 = vld [vmem:[#allocation7 + $0x90] sm:$0xff] }
  0x51   :  { %v815_v31 = vpack.c.bf16 %v262_v29, %v261_v28  ;;  %v264_v32 = vld [vmem:[#allocation7 + $0x98] sm:$0xff]  ;;  %v265_v34 = vld [vmem:[#allocation7 + $0xa0] sm:$0xff]  ;;  %v266_v35 = vld [vmem:[#allocation7 + $0xa8] sm:$0xff]  ;;  %p992_p8 = pnand %p991_p7, %p985_p4 }
  0x52   :  { %795 = vmatpush3.bf16.msra.mxu1 %v794_v9  ;;  %v818_v33 = vpack.c.bf16 %v264_v32, %v263_v30  ;;  %v821_v36 = vpack.c.bf16 %v266_v35, %v265_v34  ;;  %v267_v37 = vld [vmem:[#allocation7 + $0xb0] sm:$0xff]  ;;  %v268_v38 = vld [vmem:[#allocation7 + $0xb8] sm:$0xff]  ;;  %v269_v40 = vld [vmem:[#allocation7 + $0xc0] sm:$0xff] }
  0x53   :  { %796 = vmatprep.subr.bf16.mxu1 %v1022_v1  ;;  %816 = vmatpush3.bf16.msra.mxu0 %v815_v31  ;;  %v824_v39 = vpack.c.bf16 %v268_v38, %v267_v37  ;;  %v270_v41 = vld [vmem:[#allocation7 + $0xc8] sm:$0xff]  ;;  %v271_v43 = vld [vmem:[#allocation7 + $0xd0] sm:$0xff]  ;;  %v272_v44 = vld [vmem:[#allocation7 + $0xd8] sm:$0xff] }
  0x54   :  { %817 = vmatprep.subr.bf16.mxu0 %v1022_v1  ;;  %v827_v42 = vpack.c.bf16 %v270_v41, %v269_v40  ;;  %v830_v45 = vpack.c.bf16 %v272_v44, %v271_v43  ;;  %v273_v46 = vld [vmem:[#allocation7 + $0xe0] sm:$0xff]  ;;  %v274_v47 = vld [vmem:[#allocation7 + $0xe8] sm:$0xff]  ;;  %v275_v55 = vld [vmem:[#allocation7 + $0xf0] sm:$0xff] }
  0x55   :  { %v833_v48 = vpack.c.bf16 %v274_v47, %v273_v46  ;;  %v567_v49 = vld [vmem:[%s1184_s2] ss:$0 sm:$0xff]  ;;  %v276_v56 = vld [vmem:[#allocation7 + $0xf8] sm:$0xff]  ;;  %v359_v58 = vld [vmem:[#allocation7 + $0x100] sm:$0xff] }
  0x56   :  { %798 = vmatpush3.bf16.msra.mxu1 %v797_v12  ;;  %v836_v57 = vpack.c.bf16 %v276_v56, %v275_v55  ;;  %v360_v59 = vld [vmem:[#allocation7 + $0x108] sm:$0xff]  ;;  %v361_v60 = vld [vmem:[#allocation7 + $0x110] sm:$0xff]  ;;  %v362_v62 = vld [vmem:[#allocation7 + $0x118] sm:$0xff] }
  0x57   :  { %799 = vmatprep.subr.bf16.mxu1 %v1022_v1  ;;  %819 = vmatpush3.bf16.msra.mxu0 %v818_v33  ;;  %v839_v61 = vpack.c.bf16 %v360_v59, %v359_v58  ;;  %v842_v63 = vpack.c.bf16 %v362_v62, %v361_v60  ;;  %v363_v2 = vld [vmem:[#allocation7 + $0x120] sm:$0xff]  ;;  %v364_v3 = vld [vmem:[#allocation7 + $0x128] sm:$0xff]  ;;  %v365_v5 = vld [vmem:[#allocation7 + $0x130] sm:$0xff] }
  0x58   :  { %820 = vmatprep.subr.bf16.mxu0 %v1022_v1  ;;  %v845_v4 = vpack.c.bf16 %v364_v3, %v363_v2  ;;  %v366_v6 = vld [vmem:[#allocation7 + $0x138] sm:$0xff]  ;;  %v367_v8 = vld [vmem:[#allocation7 + $0x140] sm:$0xff]  ;;  %v368_v9 = vld [vmem:[#allocation7 + $0x148] sm:$0xff] }
  0x59   :  { %v848_v7 = vpack.c.bf16 %v366_v6, %v365_v5  ;;  %v851_v10 = vpack.c.bf16 %v368_v9, %v367_v8  ;;  %v369_v11 = vld [vmem:[#allocation7 + $0x150] sm:$0xff]  ;;  %v370_v12 = vld [vmem:[#allocation7 + $0x158] sm:$0xff]  ;;  %v371_v14 = vld [vmem:[#allocation7 + $0x160] sm:$0xff] }
  0x5a   :  { %801 = vmatpush3.bf16.msra.mxu1 %v800_v15  ;;  %v854_v13 = vpack.c.bf16 %v370_v12, %v369_v11  ;;  %v372_v15 = vld [vmem:[#allocation7 + $0x168] sm:$0xff]  ;;  %v373_v23 = vld [vmem:[#allocation7 + $0x170] sm:$0xff]  ;;  %v456_v26 = vld [vmem:[#allocation8] sm:$0xff] }
  0x5b   :  { %802 = vmatprep.subr.bf16.mxu1 %v1022_v1  ;;  %822 = vmatpush3.bf16.msra.mxu0 %v821_v36  ;;  %v857_v16 = vpack.c.bf16 %v372_v15, %v371_v14  ;;  %v569_v17 = vld [vmem:[%s1186_s4] ss:$0 sm:$0xff]  ;;  %v458_v28 = vld [vmem:[#allocation8 + $0x10] sm:$0xff]  ;;  %v459_v30 = vld [vmem:[#allocation8 + $0x18] sm:$0xff] }
  0x5c   :  { %823 = vmatprep.subr.bf16.mxu0 %v1022_v1  ;;  %v866_v31 = vpack.c.bf16 %v459_v30, %v458_v28  ;;  %v460_v32 = vld [vmem:[#allocation8 + $0x20] sm:$0xff]  ;;  %v461_v33 = vld [vmem:[#allocation8 + $0x28] sm:$0xff]  ;;  %v463_v35 = vld [vmem:[#allocation8 + $0x38] sm:$0xff] }
  0x5d   :  { %v869_v34 = vpack.c.bf16 %v461_v33, %v460_v32  ;;  %v464_v37 = vld [vmem:[#allocation8 + $0x40] sm:$0xff]  ;;  %v465_v38 = vld [vmem:[#allocation8 + $0x48] sm:$0xff]  ;;  %v466_v40 = vld [vmem:[#allocation8 + $0x50] sm:$0xff] }
  0x5e   :  { %804 = vmatpush3.bf16.msra.mxu1 %v803_v18  ;;  %v467_v41 = vld [vmem:[#allocation8 + $0x58] sm:$0xff]  ;;  %v468_v43 = vld [vmem:[#allocation8 + $0x60] sm:$0xff]  ;;  %v469_v44 = vld [vmem:[#allocation8 + $0x68] sm:$0xff] }
  0x5f   :  { %805 = vmatprep.subr.bf16.mxu1 %v1022_v1  ;;  %825 = vmatpush3.bf16.msra.mxu0 %v824_v39  ;;  %v875_v39 = vpack.c.bf16 %v465_v38, %v464_v37  ;;  %v571_v46 = vld [vmem:[%s1186_s4 + $0x1] ss:$0 sm:$0xff]  ;;  %v573_v55 = vld [vmem:[%s1186_s4 + $0x2] ss:$0 sm:$0xff]  ;;  %v574_v60 = vld [vmem:[%s1188_s6] ss:$0 sm:$0xff] }
  0x60   :  { %826 = vmatprep.subr.bf16.mxu0 %v1022_v1 }
  0x62   :  { %807 = vmatpush3.bf16.msra.mxu1 %v806_v21 }
  0x63   :  { %808 = vmatprep.subr.bf16.mxu1 %v1022_v1  ;;  %828 = vmatpush3.bf16.msra.mxu0 %v827_v42  ;;  %v878_v42 = vpack.c.bf16 %v467_v41, %v466_v40 }
  0x64   :  { %829 = vmatprep.subr.bf16.mxu0 %v1022_v1 }
  0x66   :  { %810 = vmatpush3.bf16.msra.mxu1 %v809_v24  ;;  %v374_v24 = vld [vmem:[#allocation7 + $0x178] sm:$0xff] }
  0x67   :  { %811 = vmatprep.subr.bf16.mxu1 %v1022_v1  ;;  %831 = vmatpush3.bf16.msra.mxu0 %v830_v45  ;;  %v860_v25 = vpack.c.bf16 %v374_v24, %v373_v23  ;;  %v881_v45 = vpack.c.bf16 %v469_v44, %v468_v43 }
  0x68   :  { %832 = vmatprep.subr.bf16.mxu0 %v1022_v1 }
  0x6a   :  { %813 = vmatpush3.bf16.msra.mxu1 %v812_v27  ;;  %v457_v27 = vld [vmem:[#allocation8 + $0x8] sm:$0xff] }
  0x6b   :  { %838 = vmatprep.subr.bf16.mxu1 %v1022_v1  ;;  %834 = vmatpush3.bf16.msra.mxu0 %v833_v48  ;;  %v863_v29 = vpack.c.bf16 %v457_v27, %v456_v26 }
  0x6c   :  { %835 = vmatprep.subr.bf16.mxu0 %v1022_v1 }
  0x6f   :  { %837 = vmatpush3.bf16.msra.mxu0 %v836_v57 }
  0x70   :  { %862 = vmatprep.subr.bf16.mxu0 %v1022_v1 }
 0x120   :  { %v157_v50 = vpop.f32.mrb[0].mxu0 }
 0x121   :  { %v158_v51 = vadd.f32 %v567_v49, %v157_v50  ;;  %v649_v52 = vpop.f32.mrb[1].mxu0 }
 0x122   :  { %v470_v52 = vld [vmem:[#allocation8 + $0x70] sm:$0xff] }
 0x123   :  { %v162_v53 = vmul.f32 0.01, %v158_v51  ;;  %vm161_vm2 = vcmp.gt.f32.partialorder %v158_v51, 0.0 }
 0x125   :  { %v163_v54 = vsel %vm161_vm2, %v158_v51, %v162_v53  ;;  %v471_v53 = vld [vmem:[#allocation8 + $0x78] sm:$0xff] }
 0x126   :  { %683 = vmatmul.mubr.f32.vlgmr.msra.gmra.mrb[0].mxu1 %v163_v54  ;;  %v884_v54 = vpack.c.bf16 %v471_v53, %v470_v52 }
 0x127   :  { %752 = vmatprep.mubr.msk.f32.mxu1 %vm1021_vm0, %v1020_v0  ;;  %840 = vmatpush3.bf16.msra.mxu1 %v839_v61 }
 0x128   :  { %841 = vmatprep.subr.bf16.mxu1 %v1022_v1 }
 0x12b   :  { %843 = vmatpush3.bf16.msra.mxu1 %v842_v63 }
 0x12c   :  { %844 = vmatprep.subr.bf16.mxu1 %v1022_v1 }
 0x12f   :  { %846 = vmatpush3.bf16.msra.mxu1 %v845_v4 }
 0x130   :  { %847 = vmatprep.subr.bf16.mxu1 %v1022_v1 }
 0x133   :  { %849 = vmatpush3.bf16.msra.mxu1 %v848_v7 }
 0x134   :  { %850 = vmatprep.subr.bf16.mxu1 %v1022_v1 }
 0x137   :  { %852 = vmatpush3.bf16.msra.mxu1 %v851_v10 }
 0x138   :  { %853 = vmatprep.subr.bf16.mxu1 %v1022_v1 }
 0x13b   :  { %855 = vmatpush3.bf16.msra.mxu1 %v854_v13 }
 0x13c   :  { %856 = vmatprep.subr.bf16.mxu1 %v1022_v1 }
 0x13f   :  { %858 = vmatpush3.bf16.msra.mxu1 %v857_v16 }
 0x140   :  { %859 = vmatprep.subr.bf16.mxu1 %v1022_v1 }
 0x143   :  { %861 = vmatpush3.bf16.msra.mxu1 %v860_v25 }
 0x1f9   :  { %v253_v18 = vpop.f32.mrb[0].mxu1 }
 0x1fa   :  { %v254_v19 = vadd.f32 %v569_v17, %v253_v18  ;;  %v684_v20 = vpop.f32.mrb[1].mxu1 }
 0x1fc   :  { %vm257_vm3 = vcmp.gt.f32.partialorder %v254_v19, 0.0  ;;  %v258_v21 = vmul.f32 0.01, %v254_v19 }
 0x1fe   :  { %v259_v22 = vsel %vm257_vm3, %v254_v19, %v258_v21 }
 0x1ff   :  { %718 = vmatmul.mubr.f32.vlgmr.msra.gmra.mrb[2].mxu0 %v259_v22 }
 0x200   :  { %787 = vmatprep.mubr.msk.f32.mxu0 %vm1021_vm0, %v1020_v0  ;;  %864 = vmatpush3.bf16.msra.mxu0 %v863_v29  ;;  %v462_v0 = vld [vmem:[#allocation8 + $0x30] sm:$0xff] }
 0x201   :  { %865 = vmatprep.subr.bf16.mxu0 %v1022_v1  ;;  %v872_v36 = vpack.c.bf16 %v463_v35, %v462_v0 }
 0x204   :  { %867 = vmatpush3.bf16.msra.mxu0 %v866_v31 }
 0x205   :  { %868 = vmatprep.subr.bf16.mxu0 %v1022_v1 }
 0x208   :  { %870 = vmatpush3.bf16.msra.mxu0 %v869_v34 }
 0x209   :  { %871 = vmatprep.subr.bf16.mxu0 %v1022_v1 }
 0x20c   :  { %873 = vmatpush3.bf16.msra.mxu0 %v872_v36 }
 0x20d   :  { %874 = vmatprep.subr.bf16.mxu0 %v1022_v1 }
 0x210   :  { %876 = vmatpush3.bf16.msra.mxu0 %v875_v39 }
 0x211   :  { %877 = vmatprep.subr.bf16.mxu0 %v1022_v1 }
 0x214   :  { %879 = vmatpush3.bf16.msra.mxu0 %v878_v42 }
 0x215   :  { %880 = vmatprep.subr.bf16.mxu0 %v1022_v1 }
 0x218   :  { %882 = vmatpush3.bf16.msra.mxu0 %v881_v45 }
 0x219   :  { %883 = vmatprep.subr.bf16.mxu0 %v1022_v1 }
 0x21c   :  { %885 = vmatpush3.bf16.msra.mxu0 %v884_v54 }
 0x2d2   :  { %v351_v47 = vpop.f32.mrb[2].mxu0 }
 0x2d3   :  { %v352_v48 = vadd.f32 %v571_v46, %v351_v47  ;;  %v719_v49 = vpop.f32.mrb[3].mxu0 }
 0x2d5   :  { %vm355_vm4 = vcmp.gt.f32.partialorder %v352_v48, 0.0  ;;  %v356_v50 = vmul.f32 0.01, %v352_v48 }
 0x2d7   :  { %v357_v51 = vsel %vm355_vm4, %v352_v48, %v356_v50 }
 0x2d8   :  { %753 = vmatmul.mubr.f32.vlgmr.msra.gmra.mrb[2].mxu1 %v357_v51 }
 0x3ab   :  { %v449_v1 = vpop.f32.mrb[2].mxu1 }
 0x3ac   :  { %v450_v56 = vadd.f32 %v573_v55, %v449_v1  ;;  %v754_v57 = vpop.f32.mrb[3].mxu1 }
 0x3ae   :  { %vm453_vm5 = vcmp.gt.f32.partialorder %v450_v56, 0.0  ;;  %v454_v58 = vmul.f32 0.01, %v450_v56 }
 0x3b0   :  { %v455_v59 = vsel %vm453_vm5, %v450_v56, %v454_v58 }
 0x3b1   :  { %788 = vmatmul.mubr.f32.vlgmr.msra.gmra.mrb[4].mxu0 %v455_v59 }
 0x484   :  { %v545_v61 = vpop.f32.mrb[4].mxu0 }
 0x485   :  { %v546_v62 = vadd.f32 %v574_v60, %v545_v61  ;;  %v789_v63 = vpop.f32.mrb[5].mxu0 }
 0x487   :  { %549 = vst [vmem:[#allocation10] sm:$0x3] %v546_v62 }
 0x488   :  { %995 = shalt.err (!%p992_p8)
}
 0x489   :  { %s996_s12 = scalar_lea.hbm %s1189_s7, 32 }
 0x48a   :  { %p997_p9 = scmp.ne.s32.totalorder %s1189_s7, %s996_s12  ;;  %p1000_p10 = scmp.lt.u32.totalorder %s996_s12, %s1189_s7 }
 0x48c   :  { %p1002_p11 = pnand %p1000_p10, %p997_p9 }
 0x48e   :  { %1005 = shalt.err (!%p1002_p11)
}
 0x48f   :  { %559 = dma.vmem_to_hbm [thread:$0]  %s557_s11, 32, %s1189_s7, [#allocation4]  }
 0x490   :  { %1012 = dma.done.wait [#allocation4], 32  }
 0x491   :  { %1013 = vsyncadd [#allocation4], 4294967264 }
 0x492   :  { %563 = vsyncpa [#allocation3], 1 }
 0x493   :  { %564 = vsyncpa [#allocation6], 1 }
 0x494   :  { %565 = vsyncpa [#allocation9], 1 }
 0x495   :  { %566 = vsyncpa [#allocation4], 1 }

// kernel: tpu_custom_call.1
= control target key start
LH: loop header
LB: loop body
LE: loop exit
PB: predicated region body
PF: predicated region fallthrough
CT: control target
= control target key end

     0   :  { %12 = vsyncpa [#allocation3], 0  ;;  %s1182_s0 = inlined_call_operand.hbm [shape: f32[2,8], index: 0, kind: input, shape index: {}]   ;;  %s1183_s1 = inlined_call_operand.hbm [shape: f32[8,128], index: 1, kind: input, shape index: {}]   ;;  %s1184_s2 = inlined_call_operand.vmem [shape: f32[1,128], index: 2, kind: input, shape index: {}]   ;;  %s1185_s3 = inlined_call_operand.hbm [shape: f32[3,128,128], index: 3, kind: input, shape index: {}]   ;;  %s1186_s4 = inlined_call_operand.vmem [shape: f32[3,1,128], index: 4, kind: input, shape index: {}]   ;;  %s1187_s5 = inlined_call_operand.hbm [shape: f32[128,128], index: 5, kind: input, shape index: {}]   ;;  %s1188_s6 = inlined_call_operand.vmem [shape: f32[1,128], index: 6, kind: input, shape index: {}]   ;;  %s1189_s7 = inlined_call_operand.hbm [shape: f32[2,128], index: 7, kind: output, shape index: {}]  }
   0x1   :  { %13 = vsyncpa [#allocation6], 0 }
   0x2   :  { %14 = vsyncpa [#allocation9], 0 }
   0x3   :  { %15 = vsyncpa [#allocation4], 0  ;;  %s1014_s24 = smov [#allocation5]   ;;  %s1015_s26 = smov [#allocation2]  }
   0x4   :  { %s32_s25 = sshll.u32 %s1014_s24, 4  ;;  %s22_s27 = sshll.u32 %s1015_s26, 4  ;;  %s33_s25 = int_to_ptr.vmem [resolvable:$true] %s32_s25  ;;  %s23_s27 = int_to_ptr.vmem [resolvable:$true] %s22_s27 }
   0x5   :  { %s896_s30 = scalar_lea.hbm %s1183_s1, 128 }
   0x6   :  { %p897_p0 = scmp.ne.s32.totalorder %s1183_s1, %s896_s30  ;;  %p900_p1 = scmp.lt.u32.totalorder %s896_s30, %s1183_s1 }
   0x8   :  { %p902_p2 = pnand %p900_p1, %p897_p0 }
   0xa   :  { %905 = shalt.err (!%p902_p2)
}
   0xb   :  { %s906_s12 = scalar_lea.vmem %s33_s25, 128  ;;  %p911_p4 = scmp.lt.s32.totalorder %s33_s25, %s33_s25 }
   0xc   :  { %p907_p3 = scmp.ne.s32.totalorder %s33_s25, %s906_s12  ;;  %p912_p5 = scmp.lt.s32.totalorder %s906_s12, %s906_s12 }
   0xe   :  { %p913_p6 = por %p912_p5, %p911_p4 }
  0x10   :  { %p914_p7 = pnand %p913_p6, %p907_p3 }
  0x12   :  { %917 = shalt.err (!%p914_p7)
}
  0x13   :  { %35 = dma.hbm_to_vmem [thread:$0]  %s1183_s1, 128, %s33_s25, [#allocation6]  }
  0x14   :  { %s918_s17 = scalar_lea.hbm %s1182_s0, 32 }
  0x15   :  { %p919_p8 = scmp.ne.s32.totalorder %s1182_s0, %s918_s17  ;;  %p922_p9 = scmp.lt.u32.totalorder %s918_s17, %s1182_s0 }
  0x17   :  { %p924_p10 = pnand %p922_p9, %p919_p8 }
  0x19   :  { %927 = shalt.err (!%p924_p10)
}
  0x1a   :  { %s928_s22 = scalar_lea.vmem %s23_s27, 32  ;;  %p933_p12 = scmp.lt.s32.totalorder %s23_s27, %s23_s27 }
  0x1b   :  { %p929_p11 = scmp.ne.s32.totalorder %s23_s27, %s928_s22  ;;  %p934_p13 = scmp.lt.s32.totalorder %s928_s22, %s928_s22 }
  0x1d   :  { %p935_p0 = por %p934_p13, %p933_p12 }
  0x1f   :  { %p936_p1 = pnand %p935_p0, %p929_p11 }
  0x21   :  { %939 = shalt.err (!%p936_p1)
}
  0x22   :  { %25 = dma.hbm_to_vmem [thread:$0]  %s1182_s0, 32, %s23_s27, [#allocation3]  }
  0x23   :  { %s1016_s24 = smov [#allocation7]   ;;  %s940_s29 = scalar_lea.hbm %s1185_s3, 6144 }
  0x24   :  { %s43_s25 = sshll.u32 %s1016_s24, 4  ;;  %p941_p2 = scmp.ne.s32.totalorder %s1185_s3, %s940_s29  ;;  %s44_s25 = int_to_ptr.vmem [resolvable:$true] %s43_s25 }
  0x25   :  { %p944_p3 = scmp.lt.u32.totalorder %s940_s29, %s1185_s3 }
  0x27   :  { %p946_p4 = pnand %p944_p3, %p941_p2 }
  0x29   :  { %949 = shalt.err (!%p946_p4)
}
  0x2a   :  { %s950_s11 = scalar_lea.vmem %s44_s25, 6144  ;;  %p955_p6 = scmp.lt.s32.totalorder %s44_s25, %s44_s25 }
  0x2b   :  { %p951_p5 = scmp.ne.s32.totalorder %s44_s25, %s950_s11  ;;  %p956_p7 = scmp.lt.s32.totalorder %s950_s11, %s950_s11 }
  0x2d   :  { %p957_p8 = por %p956_p7, %p955_p6 }
  0x2f   :  { %p958_p9 = pnand %p957_p8, %p951_p5 }
  0x31   :  { %961 = shalt.err (!%p958_p9)
}
  0x32   :  { %s1017_s0 = smov 128   ;;  %s1018_s27 = smov 8  }
  0x33   :  { %49 = dma.hbm_to_vmem [thread:$0]  %s1185_s3, 6144, %s44_s25, [#allocation6], %s1017_s0, %s1017_s0, %s1018_s27  }
  0x34   :  { %s1019_s14 = smov [#allocation8]   ;;  %s962_s18 = scalar_lea.hbm %s1187_s5, 2048 }
  0x35   :  { %s57_s15 = sshll.u32 %s1019_s14, 4  ;;  %p963_p10 = scmp.ne.s32.totalorder %s1187_s5, %s962_s18  ;;  %s58_s15 = int_to_ptr.vmem [resolvable:$true] %s57_s15 }
  0x36   :  { %p966_p11 = scmp.lt.u32.totalorder %s962_s18, %s1187_s5 }
  0x38   :  { %p968_p12 = pnand %p966_p11, %p963_p10 }
  0x3a   :  { %971 = shalt.err (!%p968_p12)
}
  0x3b   :  { %s972_s1 = scalar_lea.vmem %s58_s15, 2048  ;;  %p977_p0 = scmp.lt.s32.totalorder %s58_s15, %s58_s15 }
  0x3c   :  { %p973_p13 = scmp.ne.s32.totalorder %s58_s15, %s972_s1  ;;  %p978_p1 = scmp.lt.s32.totalorder %s972_s1, %s972_s1 }
  0x3e   :  { %p979_p2 = por %p978_p1, %p977_p0 }
  0x40   :  { %p980_p3 = pnand %p979_p2, %p973_p13 }
  0x42   :  { %983 = shalt.err (!%p980_p3)
}
  0x43   :  { %63 = dma.hbm_to_vmem [thread:$0]  %s1187_s5, 2048, %s58_s15, [#allocation9], %s1017_s0, %s1017_s0, %s1018_s27  }
  0x44   :  { %1006 = dma.done.wait [#allocation3], 32  }
  0x45   :  { %1007 = vsyncadd [#allocation3], 4294967264 }
  0x46   :  { %1008 = dma.done.wait [#allocation6], 6272  }
  0x47   :  { %1009 = vsyncadd [#allocation6], 4294961024 }
  0x48   :  { %1010 = dma.done.wait [#allocation9], 2048  }
  0x49   :  { %1011 = vsyncadd [#allocation9], 4294965248  ;;  %v1020_v0 = vmov 0.0   ;;  %vm1021_vm0 = vmmov 0   ;;  %v1022_v1 = vmov 0.0|0.0   ;;  %vm87_vm1 = vcmask 64512  }
  0x4a   :  { %645 = vmatprep.subr.mxu0 %v1020_v0  ;;  %647 = vmatprep.mubr.msk.f32.mxu0 %vm1021_vm0, %v1020_v0  ;;  %v79_v2 = vld [vmem:[#allocation5] sm:$0xff]  ;;  %v78_v3 = vld [vmem:[#allocation2] sm:$0x3]  ;;  %v164_v4 = vld [vmem:[#allocation7] sm:$0xff]  ;;  %s1023_s10 = smov [#allocation10]  }
  0x4b   :  { %790 = vmatprep.subr.bf16.mxu1 %v1022_v1  ;;  %682 = vmatprep.mubr.msk.f32.mxu1 %vm1021_vm0, %v1020_v0  ;;  %v165_v5 = vld [vmem:[#allocation7 + $0x8] sm:$0xff]  ;;  %v166_v6 = vld [vmem:[#allocation7 + $0x10] sm:$0xff]  ;;  %v167_v7 = vld [vmem:[#allocation7 + $0x18] sm:$0xff]  ;;  %s556_s11 = sshll.u32 %s1023_s10, 4  ;;  %s557_s11 = int_to_ptr.vmem [resolvable:$true] %s556_s11 }
  0x4c   :  { %646 = vmatpush3.msra.mxu0 %v79_v2  ;;  %v791_v8 = vpack.c.bf16 %v165_v5, %v164_v4  ;;  %v794_v9 = vpack.c.bf16 %v167_v7, %v166_v6  ;;  %v168_v10 = vld [vmem:[#allocation7 + $0x20] sm:$0xff]  ;;  %v169_v11 = vld [vmem:[#allocation7 + $0x28] sm:$0xff]  ;;  %v170_v13 = vld [vmem:[#allocation7 + $0x30] sm:$0xff]  ;;  %s984_s0 = scalar_lea.vmem %s557_s11, 32  ;;  %p989_p5 = scmp.lt.s32.totalorder %s557_s11, %s557_s11 }
  0x4d   :  { %648 = vmatmul.mubr.msk.f32.vlgmr.msra.gmra.mrb[0].mxu0 %vm87_vm1, %v78_v3  ;;  %814 = vmatprep.subr.bf16.mxu0 %v1022_v1  ;;  %v797_v12 = vpack.c.bf16 %v169_v11, %v168_v10  ;;  %v171_v14 = vld [vmem:[#allocation7 + $0x38] sm:$0xff]  ;;  %v172_v16 = vld [vmem:[#allocation7 + $0x40] sm:$0xff]  ;;  %v173_v17 = vld [vmem:[#allocation7 + $0x48] sm:$0xff]  ;;  %p985_p4 = scmp.ne.s32.totalorder %s557_s11, %s984_s0  ;;  %p990_p6 = scmp.lt.s32.totalorder %s984_s0, %s984_s0 }
  0x4e   :  { %717 = vmatprep.mubr.msk.f32.mxu0 %vm1021_vm0, %v1020_v0  ;;  %792 = vmatpush3.bf16.msra.mxu1 %v791_v8  ;;  %v800_v15 = vpack.c.bf16 %v171_v14, %v170_v13  ;;  %v803_v18 = vpack.c.bf16 %v173_v17, %v172_v16  ;;  %v174_v19 = vld [vmem:[#allocation7 + $0x50] sm:$0xff]  ;;  %v175_v20 = vld [vmem:[#allocation7 + $0x58] sm:$0xff]  ;;  %v176_v22 = vld [vmem:[#allocation7 + $0x60] sm:$0xff] }
  0x4f   :  { %793 = vmatprep.subr.bf16.mxu1 %v1022_v1  ;;  %v806_v21 = vpack.c.bf16 %v175_v20, %v174_v19  ;;  %v177_v23 = vld [vmem:[#allocation7 + $0x68] sm:$0xff]  ;;  %v178_v25 = vld [vmem:[#allocation7 + $0x70] sm:$0xff]  ;;  %v179_v26 = vld [vmem:[#allocation7 + $0x78] sm:$0xff]  ;;  %p991_p7 = por %p990_p6, %p989_p5 }
  0x50   :  { %v809_v24 = vpack.c.bf16 %v177_v23, %v176_v22  ;;  %v812_v27 = vpack.c.bf16 %v179_v26, %v178_v25  ;;  %v261_v28 = vld [vmem:[#allocation7 + $0x80] sm:$0xff]  ;;  %v262_v29 = vld [vmem:[#allocation7 + $0x88] sm:$0xff]  ;;  %v263_v30 = vld [vmem:[#allocation7 + $0x90] sm:$0xff] }
  0x51   :  { %v815_v31 = vpack.c.bf16 %v262_v29, %v261_v28  ;;  %v264_v32 = vld [vmem:[#allocation7 + $0x98] sm:$0xff]  ;;  %v265_v34 = vld [vmem:[#allocation7 + $0xa0] sm:$0xff]  ;;  %v266_v35 = vld [vmem:[#allocation7 + $0xa8] sm:$0xff]  ;;  %p992_p8 = pnand %p991_p7, %p985_p4 }
  0x52   :  { %795 = vmatpush3.bf16.msra.mxu1 %v794_v9  ;;  %v818_v33 = vpack.c.bf16 %v264_v32, %v263_v30  ;;  %v821_v36 = vpack.c.bf16 %v266_v35, %v265_v34  ;;  %v267_v37 = vld [vmem:[#allocation7 + $0xb0] sm:$0xff]  ;;  %v268_v38 = vld [vmem:[#allocation7 + $0xb8] sm:$0xff]  ;;  %v269_v40 = vld [vmem:[#allocation7 + $0xc0] sm:$0xff] }
  0x53   :  { %796 = vmatprep.subr.bf16.mxu1 %v1022_v1  ;;  %816 = vmatpush3.bf16.msra.mxu0 %v815_v31  ;;  %v824_v39 = vpack.c.bf16 %v268_v38, %v267_v37  ;;  %v270_v41 = vld [vmem:[#allocation7 + $0xc8] sm:$0xff]  ;;  %v271_v43 = vld [vmem:[#allocation7 + $0xd0] sm:$0xff]  ;;  %v272_v44 = vld [vmem:[#allocation7 + $0xd8] sm:$0xff] }
  0x54   :  { %817 = vmatprep.subr.bf16.mxu0 %v1022_v1  ;;  %v827_v42 = vpack.c.bf16 %v270_v41, %v269_v40  ;;  %v830_v45 = vpack.c.bf16 %v272_v44, %v271_v43  ;;  %v273_v46 = vld [vmem:[#allocation7 + $0xe0] sm:$0xff]  ;;  %v274_v47 = vld [vmem:[#allocation7 + $0xe8] sm:$0xff]  ;;  %v275_v55 = vld [vmem:[#allocation7 + $0xf0] sm:$0xff] }
  0x55   :  { %v833_v48 = vpack.c.bf16 %v274_v47, %v273_v46  ;;  %v567_v49 = vld [vmem:[%s1184_s2] ss:$0 sm:$0xff]  ;;  %v276_v56 = vld [vmem:[#allocation7 + $0xf8] sm:$0xff]  ;;  %v359_v58 = vld [vmem:[#allocation7 + $0x100] sm:$0xff] }
  0x56   :  { %798 = vmatpush3.bf16.msra.mxu1 %v797_v12  ;;  %v836_v57 = vpack.c.bf16 %v276_v56, %v275_v55  ;;  %v360_v59 = vld [vmem:[#allocation7 + $0x108] sm:$0xff]  ;;  %v361_v60 = vld [vmem:[#allocation7 + $0x110] sm:$0xff]  ;;  %v362_v62 = vld [vmem:[#allocation7 + $0x118] sm:$0xff] }
  0x57   :  { %799 = vmatprep.subr.bf16.mxu1 %v1022_v1  ;;  %819 = vmatpush3.bf16.msra.mxu0 %v818_v33  ;;  %v839_v61 = vpack.c.bf16 %v360_v59, %v359_v58  ;;  %v842_v63 = vpack.c.bf16 %v362_v62, %v361_v60  ;;  %v363_v2 = vld [vmem:[#allocation7 + $0x120] sm:$0xff]  ;;  %v364_v3 = vld [vmem:[#allocation7 + $0x128] sm:$0xff]  ;;  %v365_v5 = vld [vmem:[#allocation7 + $0x130] sm:$0xff] }
  0x58   :  { %820 = vmatprep.subr.bf16.mxu0 %v1022_v1  ;;  %v845_v4 = vpack.c.bf16 %v364_v3, %v363_v2  ;;  %v366_v6 = vld [vmem:[#allocation7 + $0x138] sm:$0xff]  ;;  %v367_v8 = vld [vmem:[#allocation7 + $0x140] sm:$0xff]  ;;  %v368_v9 = vld [vmem:[#allocation7 + $0x148] sm:$0xff] }
  0x59   :  { %v848_v7 = vpack.c.bf16 %v366_v6, %v365_v5  ;;  %v851_v10 = vpack.c.bf16 %v368_v9, %v367_v8  ;;  %v369_v11 = vld [vmem:[#allocation7 + $0x150] sm:$0xff]  ;;  %v370_v12 = vld [vmem:[#allocation7 + $0x158] sm:$0xff]  ;;  %v371_v14 = vld [vmem:[#allocation7 + $0x160] sm:$0xff] }
  0x5a   :  { %801 = vmatpush3.bf16.msra.mxu1 %v800_v15  ;;  %v854_v13 = vpack.c.bf16 %v370_v12, %v369_v11  ;;  %v372_v15 = vld [vmem:[#allocation7 + $0x168] sm:$0xff]  ;;  %v373_v23 = vld [vmem:[#allocation7 + $0x170] sm:$0xff]  ;;  %v456_v26 = vld [vmem:[#allocation8] sm:$0xff] }
  0x5b   :  { %802 = vmatprep.subr.bf16.mxu1 %v1022_v1  ;;  %822 = vmatpush3.bf16.msra.mxu0 %v821_v36  ;;  %v857_v16 = vpack.c.bf16 %v372_v15, %v371_v14  ;;  %v569_v17 = vld [vmem:[%s1186_s4] ss:$0 sm:$0xff]  ;;  %v458_v28 = vld [vmem:[#allocation8 + $0x10] sm:$0xff]  ;;  %v459_v30 = vld [vmem:[#allocation8 + $0x18] sm:$0xff] }
  0x5c   :  { %823 = vmatprep.subr.bf16.mxu0 %v1022_v1  ;;  %v866_v31 = vpack.c.bf16 %v459_v30, %v458_v28  ;;  %v460_v32 = vld [vmem:[#allocation8 + $0x20] sm:$0xff]  ;;  %v461_v33 = vld [vmem:[#allocation8 + $0x28] sm:$0xff]  ;;  %v463_v35 = vld [vmem:[#allocation8 + $0x38] sm:$0xff] }
  0x5d   :  { %v869_v34 = vpack.c.bf16 %v461_v33, %v460_v32  ;;  %v464_v37 = vld [vmem:[#allocation8 + $0x40] sm:$0xff]  ;;  %v465_v38 = vld [vmem:[#allocation8 + $0x48] sm:$0xff]  ;;  %v466_v40 = vld [vmem:[#allocation8 + $0x50] sm:$0xff] }
  0x5e   :  { %804 = vmatpush3.bf16.msra.mxu1 %v803_v18  ;;  %v467_v41 = vld [vmem:[#allocation8 + $0x58] sm:$0xff]  ;;  %v468_v43 = vld [vmem:[#allocation8 + $0x60] sm:$0xff]  ;;  %v469_v44 = vld [vmem:[#allocation8 + $0x68] sm:$0xff] }
  0x5f   :  { %805 = vmatprep.subr.bf16.mxu1 %v1022_v1  ;;  %825 = vmatpush3.bf16.msra.mxu0 %v824_v39  ;;  %v875_v39 = vpack.c.bf16 %v465_v38, %v464_v37  ;;  %v571_v46 = vld [vmem:[%s1186_s4 + $0x1] ss:$0 sm:$0xff]  ;;  %v573_v55 = vld [vmem:[%s1186_s4 + $0x2] ss:$0 sm:$0xff]  ;;  %v574_v60 = vld [vmem:[%s1188_s6] ss:$0 sm:$0xff] }
  0x60   :  { %826 = vmatprep.subr.bf16.mxu0 %v1022_v1 }
  0x62   :  { %807 = vmatpush3.bf16.msra.mxu1 %v806_v21 }
  0x63   :  { %808 = vmatprep.subr.bf16.mxu1 %v1022_v1  ;;  %828 = vmatpush3.bf16.msra.mxu0 %v827_v42  ;;  %v878_v42 = vpack.c.bf16 %v467_v41, %v466_v40 }
  0x64   :  { %829 = vmatprep.subr.bf16.mxu0 %v1022_v1 }
  0x66   :  { %810 = vmatpush3.bf16.msra.mxu1 %v809_v24  ;;  %v374_v24 = vld [vmem:[#allocation7 + $0x178] sm:$0xff] }
  0x67   :  { %811 = vmatprep.subr.bf16.mxu1 %v1022_v1  ;;  %831 = vmatpush3.bf16.msra.mxu0 %v830_v45  ;;  %v860_v25 = vpack.c.bf16 %v374_v24, %v373_v23  ;;  %v881_v45 = vpack.c.bf16 %v469_v44, %v468_v43 }
  0x68   :  { %832 = vmatprep.subr.bf16.mxu0 %v1022_v1 }
  0x6a   :  { %813 = vmatpush3.bf16.msra.mxu1 %v812_v27  ;;  %v457_v27 = vld [vmem:[#allocation8 + $0x8] sm:$0xff] }
  0x6b   :  { %838 = vmatprep.subr.bf16.mxu1 %v1022_v1  ;;  %834 = vmatpush3.bf16.msra.mxu0 %v833_v48  ;;  %v863_v29 = vpack.c.bf16 %v457_v27, %v456_v26 }
  0x6c   :  { %835 = vmatprep.subr.bf16.mxu0 %v1022_v1 }
  0x6f   :  { %837 = vmatpush3.bf16.msra.mxu0 %v836_v57 }
  0x70   :  { %862 = vmatprep.subr.bf16.mxu0 %v1022_v1 }
 0x120   :  { %v157_v50 = vpop.f32.mrb[0].mxu0 }
 0x121   :  { %v158_v51 = vadd.f32 %v567_v49, %v157_v50  ;;  %v649_v52 = vpop.f32.mrb[1].mxu0 }
 0x122   :  { %v470_v52 = vld [vmem:[#allocation8 + $0x70] sm:$0xff] }
 0x123   :  { %v162_v53 = vmul.f32 0.01, %v158_v51  ;;  %vm161_vm2 = vcmp.gt.f32.partialorder %v158_v51, 0.0 }
 0x125   :  { %v163_v54 = vsel %vm161_vm2, %v158_v51, %v162_v53  ;;  %v471_v53 = vld [vmem:[#allocation8 + $0x78] sm:$0xff] }
 0x126   :  { %683 = vmatmul.mubr.f32.vlgmr.msra.gmra.mrb[0].mxu1 %v163_v54  ;;  %v884_v54 = vpack.c.bf16 %v471_v53, %v470_v52 }
 0x127   :  { %752 = vmatprep.mubr.msk.f32.mxu1 %vm1021_vm0, %v1020_v0  ;;  %840 = vmatpush3.bf16.msra.mxu1 %v839_v61 }
 0x128   :  { %841 = vmatprep.subr.bf16.mxu1 %v1022_v1 }
 0x12b   :  { %843 = vmatpush3.bf16.msra.mxu1 %v842_v63 }
 0x12c   :  { %844 = vmatprep.subr.bf16.mxu1 %v1022_v1 }
 0x12f   :  { %846 = vmatpush3.bf16.msra.mxu1 %v845_v4 }
 0x130   :  { %847 = vmatprep.subr.bf16.mxu1 %v1022_v1 }
 0x133   :  { %849 = vmatpush3.bf16.msra.mxu1 %v848_v7 }
 0x134   :  { %850 = vmatprep.subr.bf16.mxu1 %v1022_v1 }
 0x137   :  { %852 = vmatpush3.bf16.msra.mxu1 %v851_v10 }
 0x138   :  { %853 = vmatprep.subr.bf16.mxu1 %v1022_v1 }
 0x13b   :  { %855 = vmatpush3.bf16.msra.mxu1 %v854_v13 }
 0x13c   :  { %856 = vmatprep.subr.bf16.mxu1 %v1022_v1 }
 0x13f   :  { %858 = vmatpush3.bf16.msra.mxu1 %v857_v16 }
 0x140   :  { %859 = vmatprep.subr.bf16.mxu1 %v1022_v1 }
 0x143   :  { %861 = vmatpush3.bf16.msra.mxu1 %v860_v25 }
 0x1f9   :  { %v253_v18 = vpop.f32.mrb[0].mxu1 }
 0x1fa   :  { %v254_v19 = vadd.f32 %v569_v17, %v253_v18  ;;  %v684_v20 = vpop.f32.mrb[1].mxu1 }
 0x1fc   :  { %vm257_vm3 = vcmp.gt.f32.partialorder %v254_v19, 0.0  ;;  %v258_v21 = vmul.f32 0.01, %v254_v19 }
 0x1fe   :  { %v259_v22 = vsel %vm257_vm3, %v254_v19, %v258_v21 }
 0x1ff   :  { %718 = vmatmul.mubr.f32.vlgmr.msra.gmra.mrb[2].mxu0 %v259_v22 }
 0x200   :  { %787 = vmatprep.mubr.msk.f32.mxu0 %vm1021_vm0, %v1020_v0  ;;  %864 = vmatpush3.bf16.msra.mxu0 %v863_v29  ;;  %v462_v0 = vld [vmem:[#allocation8 + $0x30] sm:$0xff] }
 0x201   :  { %865 = vmatprep.subr.bf16.mxu0 %v1022_v1  ;;  %v872_v36 = vpack.c.bf16 %v463_v35, %v462_v0 }
 0x204   :  { %867 = vmatpush3.bf16.msra.mxu0 %v866_v31 }
 0x205   :  { %868 = vmatprep.subr.bf16.mxu0 %v1022_v1 }
 0x208   :  { %870 = vmatpush3.bf16.msra.mxu0 %v869_v34 }
 0x209   :  { %871 = vmatprep.subr.bf16.mxu0 %v1022_v1 }
 0x20c   :  { %873 = vmatpush3.bf16.msra.mxu0 %v872_v36 }
 0x20d   :  { %874 = vmatprep.subr.bf16.mxu0 %v1022_v1 }
 0x210   :  { %876 = vmatpush3.bf16.msra.mxu0 %v875_v39 }
 0x211   :  { %877 = vmatprep.subr.bf16.mxu0 %v1022_v1 }
 0x214   :  { %879 = vmatpush3.bf16.msra.mxu0 %v878_v42 }
 0x215   :  { %880 = vmatprep.subr.bf16.mxu0 %v1022_v1 }
 0x218   :  { %882 = vmatpush3.bf16.msra.mxu0 %v881_v45 }
 0x219   :  { %883 = vmatprep.subr.bf16.mxu0 %v1022_v1 }
 0x21c   :  { %885 = vmatpush3.bf16.msra.mxu0 %v884_v54 }
 0x2d2   :  { %v351_v47 = vpop.f32.mrb[2].mxu0 }
 0x2d3   :  { %v352_v48 = vadd.f32 %v571_v46, %v351_v47  ;;  %v719_v49 = vpop.f32.mrb[3].mxu0 }
 0x2d5   :  { %vm355_vm4 = vcmp.gt.f32.partialorder %v352_v48, 0.0  ;;  %v356_v50 = vmul.f32 0.01, %v352_v48 }
 0x2d7   :  { %v357_v51 = vsel %vm355_vm4, %v352_v48, %v356_v50 }
 0x2d8   :  { %753 = vmatmul.mubr.f32.vlgmr.msra.gmra.mrb[2].mxu1 %v357_v51 }
 0x3ab   :  { %v449_v1 = vpop.f32.mrb[2].mxu1 }
 0x3ac   :  { %v450_v56 = vadd.f32 %v573_v55, %v449_v1  ;;  %v754_v57 = vpop.f32.mrb[3].mxu1 }
 0x3ae   :  { %vm453_vm5 = vcmp.gt.f32.partialorder %v450_v56, 0.0  ;;  %v454_v58 = vmul.f32 0.01, %v450_v56 }
 0x3b0   :  { %v455_v59 = vsel %vm453_vm5, %v450_v56, %v454_v58 }
 0x3b1   :  { %788 = vmatmul.mubr.f32.vlgmr.msra.gmra.mrb[4].mxu0 %v455_v59 }
 0x484   :  { %v545_v61 = vpop.f32.mrb[4].mxu0 }
 0x485   :  { %v546_v62 = vadd.f32 %v574_v60, %v545_v61  ;;  %v789_v63 = vpop.f32.mrb[5].mxu0 }
 0x487   :  { %549 = vst [vmem:[#allocation10] sm:$0x3] %v546_v62 }
 0x488   :  { %995 = shalt.err (!%p992_p8)
}
 0x489   :  { %s996_s12 = scalar_lea.hbm %s1189_s7, 32 }
 0x48a   :  { %p997_p9 = scmp.ne.s32.totalorder %s1189_s7, %s996_s12  ;;  %p1000_p10 = scmp.lt.u32.totalorder %s996_s12, %s1189_s7 }
 0x48c   :  { %p1002_p11 = pnand %p1000_p10, %p997_p9 }
 0x48e   :  { %1005 = shalt.err (!%p1002_p11)
}
 0x48f   :  { %559 = dma.vmem_to_hbm [thread:$0]  %s557_s11, 32, %s1189_s7, [#allocation4]  }
 0x490   :  { %1012 = dma.done.wait [#allocation4], 32  }
 0x491   :  { %1013 = vsyncadd [#allocation4], 4294967264 }
 0x492   :  { %563 = vsyncpa [#allocation3], 1 }
 0x493   :  { %564 = vsyncpa [#allocation6], 1 }
 0x494   :  { %565 = vsyncpa [#allocation9], 1 }
 0x495   :  { %566 = vsyncpa [#allocation4], 1 }

</bundles_post_ra>
